<compile_context>
chip_gen: v7x
topology: tpu7x:2x2x1
jax: 0.10.0
libtpu: 0.0.40
codegen_flags: <defaults>
</compile_context>

<pallas_src>
import functools

import jax
import jax.numpy as jnp
from jax.experimental import pallas as pl
from jax.experimental.pallas import tpu as pltpu


def _round_up(x, m):
    return (x + m - 1) // m * m


# ---------------------------------------------------------------------------
# Pass 1: input projection  gi = X @ W_ih^T + b_ih  (one big parallel matmul)
# ---------------------------------------------------------------------------
def _input_proj_kernel(x_ref, w_ref, b_ref, gi_ref):
    gi_ref[...] = (
        jnp.dot(x_ref[...], w_ref[...], preferred_element_type=jnp.float32)
        + b_ref[...]
    )


def _input_projection(x_rows, w_ih_t, b_ih_p, *, row_chunk):
    rows, e_pad = x_rows.shape
    g = w_ih_t.shape[1]
    n_chunks = rows // row_chunk
    return pl.pallas_call(
        _input_proj_kernel,
        out_shape=jax.ShapeDtypeStruct((rows, g), jnp.float32),
        grid=(n_chunks,),
        in_specs=[
            pl.BlockSpec((row_chunk, e_pad), lambda i: (i, 0)),   # X rows
            pl.BlockSpec((e_pad, g), lambda i: (0, 0)),           # W_ih^T (loop-invariant)
            pl.BlockSpec((1, g), lambda i: (0, 0)),               # b_ih
        ],
        out_specs=pl.BlockSpec((row_chunk, g), lambda i: (i, 0)),
        compiler_params=pltpu.CompilerParams(
            dimension_semantics=("parallel",),
            vmem_limit_bytes=32 * 1024 * 1024,
        ),
    )(x_rows, w_ih_t, b_ih_p)


# ---------------------------------------------------------------------------
# Pass 2: serial GRU recurrence, T_CHUNK steps per grid iteration
# PyTorch gate order: r, z, n ; gate segments are H_pad (=128k) lanes wide.
# ---------------------------------------------------------------------------
def _gru_recurrent_kernel(gi_ref, h0_ref, whh_ref, bhh_ref, out_ref, h_scr,
                          *, t_chunk, seq_len, h_pad):
    c = pl.program_id(0)

    @pl.when(c == 0)
    def _():
        h_scr[...] = h0_ref[...]

    def step(i, carry):
        t = c * t_chunk + i
        h = h_scr[...]                                   # (B_pad, H_pad) f32
        gh = jnp.dot(h.astype(whh_ref.dtype), whh_ref[...],
                     preferred_element_type=jnp.float32) + bhh_ref[...]
        gi = gi_ref[i]                                   # (B_pad, 3*H_pad) f32
        r = jax.nn.sigmoid(gi[:, 0:h_pad] + gh[:, 0:h_pad])
        z = jax.nn.sigmoid(gi[:, h_pad:2 * h_pad] + gh[:, h_pad:2 * h_pad])
        n = jnp.tanh(gi[:, 2 * h_pad:3 * h_pad] + r * gh[:, 2 * h_pad:3 * h_pad])
        h_new = (1.0 - z) * n + z * h
        # Time-padding mask: padded steps leave the hidden state unchanged.
        h_new = jnp.where(t < seq_len, h_new, h)
        h_scr[...] = h_new
        out_ref[i] = h_new
        return carry

    jax.lax.fori_loop(0, t_chunk, step, 0, unroll=True)


@functools.partial(jax.jit, static_argnames=("t_chunk", "matmul_dtype"))
def gru_forward_pallas(x_emb, h0, w_ih, w_hh, b_ih, b_hh, *,
                       t_chunk=16, matmul_dtype=jnp.float32):
    """x_emb: (B, T, E) batch-first; h0: (1, B, H);
    w_ih: (3H, E); w_hh: (3H, H); b_ih/b_hh: (3H,) (PyTorch layouts).
    Returns (output (B, T, H), hidden (1, B, H))."""
    B, T, E = x_emb.shape
    H = h0.shape[-1]

    H_pad = _round_up(H, 128)
    E_pad = _round_up(E, 128)
    B_pad = _round_up(B, 8)
    t_chunk = max(1, min(t_chunk, T))
    T_pad = _round_up(T, t_chunk)

    # Per-gate padding so each gate occupies an aligned H_pad-lane segment.
    def pad_gate_w_t(w, in_dim, in_pad):
        wt = w.T                                          # (in_dim, 3H)
        parts = []
        for g in range(3):
            p = wt[:, g * H:(g + 1) * H]
            parts.append(jnp.pad(p, ((0, in_pad - in_dim), (0, H_pad - H))))
        return jnp.concatenate(parts, axis=1)             # (in_pad, 3*H_pad)

    def pad_gate_b(b):
        parts = [jnp.pad(b[g * H:(g + 1) * H], (0, H_pad - H)) for g in range(3)]
        return jnp.concatenate(parts)[None, :]            # (1, 3*H_pad)

    w_ih_t = pad_gate_w_t(w_ih, E, E_pad).astype(matmul_dtype)
    w_hh_t = pad_gate_w_t(w_hh, H, H_pad).astype(matmul_dtype)
    b_ih_p = pad_gate_b(b_ih)                             # f32 (folded into gi)
    b_hh_p = pad_gate_b(b_hh)                             # f32 (stays in recurrence)

    # Time-major, padded inputs and initial hidden.
    x_tbe = jnp.transpose(x_emb, (1, 0, 2))
    x_tbe = jnp.pad(x_tbe, ((0, T_pad - T), (0, B_pad - B), (0, E_pad - E)))
    x_rows = x_tbe.reshape(T_pad * B_pad, E_pad).astype(matmul_dtype)
    h0_p = jnp.pad(h0[0], ((0, B_pad - B), (0, H_pad - H)))

    # Pass 1: hoisted input projection (parallel, lane-dense).
    gi_rows = _input_projection(x_rows, w_ih_t, b_ih_p, row_chunk=t_chunk * B_pad)
    gi = gi_rows.reshape(T_pad, B_pad, 3 * H_pad)

    # Pass 2: serial recurrence over T-chunks.
    n_chunks = T_pad // t_chunk
    kernel = functools.partial(_gru_recurrent_kernel,
                               t_chunk=t_chunk, seq_len=T, h_pad=H_pad)
    out_tbh = pl.pallas_call(
        kernel,
        out_shape=jax.ShapeDtypeStruct((T_pad, B_pad, H_pad), jnp.float32),
        grid=(n_chunks,),
        in_specs=[
            pl.BlockSpec((t_chunk, B_pad, 3 * H_pad), lambda c: (c, 0, 0)),  # gi chunk
            pl.BlockSpec((B_pad, H_pad), lambda c: (0, 0)),                  # h0
            pl.BlockSpec((H_pad, 3 * H_pad), lambda c: (0, 0)),              # W_hh^T
            pl.BlockSpec((1, 3 * H_pad), lambda c: (0, 0)),                  # b_hh
        ],
        out_specs=pl.BlockSpec((t_chunk, B_pad, H_pad), lambda c: (c, 0, 0)),
        scratch_shapes=[pltpu.VMEM((B_pad, H_pad), jnp.float32)],            # carried h
        compiler_params=pltpu.CompilerParams(
            dimension_semantics=("arbitrary",),   # time recurrence is sequential
            vmem_limit_bytes=32 * 1024 * 1024,
        ),
    )(gi, h0_p, w_hh_t, b_hh_p)

    out = jnp.transpose(out_tbh[:T, :B, :H], (1, 0, 2))   # (B, T, H), batch_first
    h_final = out_tbh[T - 1, :B, :H][None]                # (1, B, H)
    return out, h_final


class EncoderPallas:
    """JAX/Pallas equivalent of the PyTorch Encoder (GRU, 1 layer, unidirectional)."""

    def __init__(self, inputSize, embedSize, hiddenSize, numLayers,
                 dropout, bidirectional, typ, key,
                 t_chunk=16, matmul_dtype=jnp.float32):
        assert typ.upper() == 'GRU' and numLayers == 1 and not bidirectional
        # TODO(synk): LSTM/RNN variants and multi-layer/bidirectional stacks follow
        # the same two-pass (projection + chunked recurrence) pattern; only
        # GRU x 1 layer x unidirectional is implemented here.
        self.hiddenSize = hiddenSize
        self.embedSize = embedSize
        self.inputSize = inputSize
        self.dropout_p = dropout          # eval-mode: identity
        self.t_chunk = t_chunk
        self.matmul_dtype = matmul_dtype  # bf16 on v6e/v7x for 2x MXU; f32 elementwise

        k_emb, k_ih, k_hh, k_bih, k_bhh = jax.random.split(key, 5)
        H, E = hiddenSize, embedSize
        bound = 1.0 / jnp.sqrt(H)
        # nn.Embedding default init: N(0, 1)
        self.embedding = jax.random.normal(k_emb, (inputSize, E), jnp.float32)
        # nn.GRU default init: U(-1/sqrt(H), 1/sqrt(H)); PyTorch stores (3H, E)/(3H, H)
        self.w_ih = jax.random.uniform(k_ih, (3 * H, E), jnp.float32, -bound, bound)
        self.w_hh = jax.random.uniform(k_hh, (3 * H, H), jnp.float32, -bound, bound)
        self.b_ih = jax.random.uniform(k_bih, (3 * H,), jnp.float32, -bound, bound)
        self.b_hh = jax.random.uniform(k_bhh, (3 * H,), jnp.float32, -bound, bound)

    def initHidden(self, batch_size, key):
        return jax.random.normal(key, (1, batch_size, self.hiddenSize), jnp.float32)

    def forward(self, input_ids, hidden):
        """input_ids: (B, T) int32; hidden: (1, B, H).
        Returns (output (B, T, H), hidden (1, B, H)) — matches PyTorch batch_first."""
        embed = self.embedding[input_ids]   # (B, T, E) gather (glue)
        # TODO(synk): dropout is identity here (eval mode); training-mode dropout
        # would use in-kernel pltpu.prng_seed / prng_random_bits.
        return gru_forward_pallas(embed, hidden, self.w_ih, self.w_hh,
                                  self.b_ih, self.b_hh,
                                  t_chunk=self.t_chunk,
                                  matmul_dtype=self.matmul_dtype)


def _gru_reference(x_emb, h0, w_ih, w_hh, b_ih, b_hh):
    """Pure-JAX reference matching torch.nn.GRU (batch_first)."""
    H = h0.shape[-1]

    def step(h, x_t):
        gi = x_t @ w_ih.T + b_ih
        gh = h @ w_hh.T + b_hh
        r = jax.nn.sigmoid(gi[:, 0:H] + gh[:, 0:H])
        z = jax.nn.sigmoid(gi[:, H:2 * H] + gh[:, H:2 * H])
        n = jnp.tanh(gi[:, 2 * H:3 * H] + r * gh[:, 2 * H:3 * H])
        h_new = (1.0 - z) * n + z * h
        return h_new, h_new

    hT, out_tbh = jax.lax.scan(step, h0[0], jnp.transpose(x_emb, (1, 0, 2)))
    return jnp.transpose(out_tbh, (1, 0, 2)), hT[None]


if __name__ == "__main__":
    key = jax.random.PRNGKey(0)
    k_params, k_ids, k_hid = jax.random.split(key, 3)

    # Small shapes: vocab=16, embed=32, hidden=32, batch=2, seq=8
    VOCAB, E, H, B, T = 16, 32, 32, 2, 8

    enc = EncoderPallas(inputSize=VOCAB, embedSize=E, hiddenSize=H,
                        numLayers=1, dropout=0.0, bidirectional=False,
                        typ='GRU', key=k_params)

    input_ids = jax.random.randint(k_ids, (B, T), 0, VOCAB, dtype=jnp.int32)
    hidden0 = enc.initHidden(B, k_hid)

    output, hidden = enc.forward(input_ids, hidden0)
    output = jax.block_until_ready(output)
    hidden = jax.block_until_ready(hidden)

    # Correctness check against a pure-JAX GRU reference (f32 path, tight tol).
    emb = enc.embedding[input_ids]
    ref_out, ref_hid = _gru_reference(emb, hidden0, enc.w_ih, enc.w_hh,
                                      enc.b_ih, enc.b_hh)
    assert output.shape == (B, T, H) and hidden.shape == (1, B, H)
    assert jnp.allclose(output, ref_out, atol=1e-5, rtol=1e-5)
    assert jnp.allclose(hidden, ref_hid, atol=1e-5, rtol=1e-5)

    # bf16 matmul-input variant (v6e/v7x throughput option; gate math stays f32).
    out_bf, hid_bf = gru_forward_pallas(emb, hidden0, enc.w_ih, enc.w_hh,
                                        enc.b_ih, enc.b_hh,
                                        t_chunk=8, matmul_dtype=jnp.bfloat16)
    out_bf = jax.block_until_ready(out_bf)
    assert jnp.allclose(out_bf, ref_out, atol=1e-1, rtol=1e-1)
    assert jnp.allclose(hid_bf, ref_hid, atol=1e-1, rtol=1e-1)

    print("KERNEL_OK")
</pallas_src>

<mosaic_0001>
module attributes {stable_mosaic.version = 11 : i64} {
  func.func @_input_proj_kernel(%arg0: i32, %arg1: memref<64x128xf32, #tpu.memory_space<vmem>>, %arg2: memref<128x384xf32, #tpu.memory_space<vmem>>, %arg3: memref<1x384xf32, #tpu.memory_space<vmem>>, %arg4: memref<64x384xf32, #tpu.memory_space<vmem>>) attributes {dimension_semantics = [#tpu.dimension_semantics<parallel>], iteration_bounds = array<i64: 1>, scalar_prefetch = 0 : i64, scratch_operands = 0 : i64, tpu.core_type = #tpu.core_type<tc>, window_params = [{transform_indices = @transform_0, window_bounds = array<i64: 64, 128>}, {pipeline_mode = #tpu.pipeline_mode<synchronous>, transform_indices = @transform_1, window_bounds = array<i64: 128, 384>}, {pipeline_mode = #tpu.pipeline_mode<synchronous>, transform_indices = @transform_2, window_bounds = array<i64: 1, 384>}, {transform_indices = @transform_3, window_bounds = array<i64: 64, 384>}]} {
    %c0 = arith.constant 0 : index
    %c0_0 = arith.constant 0 : index
    %0 = vector.load %arg1[%c0, %c0_0] : memref<64x128xf32, #tpu.memory_space<vmem>>, vector<64x128xf32>
    %c0_1 = arith.constant 0 : index
    %c0_2 = arith.constant 0 : index
    %1 = vector.load %arg2[%c0_1, %c0_2] : memref<128x384xf32, #tpu.memory_space<vmem>>, vector<128x384xf32>
    %cst = arith.constant dense<0.000000e+00> : vector<64x384xf32>
    %2 = tpu.matmul %0, %1, %cst {dimension_numbers = #tpu.dot_dimension_numbers<[1], [0], [0], [1], [0, 0, 1, 1], [], []>} : vector<64x128xf32>, vector<128x384xf32>, vector<64x384xf32> -> vector<64x384xf32>
    %c0_3 = arith.constant 0 : index
    %c0_4 = arith.constant 0 : index
    %3 = vector.load %arg3[%c0_3, %c0_4] : memref<1x384xf32, #tpu.memory_space<vmem>>, vector<1x384xf32>
    %4 = vector.broadcast %3 : vector<1x384xf32> to vector<64x384xf32>
    %5 = arith.addf %2, %4 : vector<64x384xf32>
    %c0_5 = arith.constant 0 : index
    %c0_6 = arith.constant 0 : index
    %6 = vector.load %arg4[%c0_5, %c0_6] : memref<64x384xf32, #tpu.memory_space<vmem>>, vector<64x384xf32>
    tpu.vector_store %arg4[%c0_5, %c0_6], %5 {strides = array<i32>} : memref<64x384xf32, #tpu.memory_space<vmem>>, vector<64x384xf32>,
    return
  }
  func.func @transform_0(%arg0: i32) -> (i32, i32) {
    %c0_i32 = arith.constant 0 : i32
    %c0_i32_0 = arith.constant 0 : i32
    return %arg0, %c0_i32 : i32, i32
  }
  func.func @transform_1(%arg0: i32) -> (i32, i32) {
    %c0_i32 = arith.constant 0 : i32
    %c0_i32_0 = arith.constant 0 : i32
    %c0_i32_1 = arith.constant 0 : i32
    return %c0_i32, %c0_i32_0 : i32, i32
  }
  func.func @transform_2(%arg0: i32) -> (i32, i32) {
    %c0_i32 = arith.constant 0 : i32
    %c0_i32_0 = arith.constant 0 : i32
    %c0_i32_1 = arith.constant 0 : i32
    return %c0_i32, %c0_i32_0 : i32, i32
  }
  func.func @transform_3(%arg0: i32) -> (i32, i32) {
    %c0_i32 = arith.constant 0 : i32
    %c0_i32_0 = arith.constant 0 : i32
    return %arg0, %c0_i32 : i32, i32
  }
}

module attributes {stable_mosaic.version = 11 : i64} {
  func.func @_gru_recurrent_kernel(%arg0: i32, %arg1: memref<8x8x384xf32, #tpu.memory_space<vmem>>, %arg2: memref<8x128xf32, #tpu.memory_space<vmem>>, %arg3: memref<128x384xf32, #tpu.memory_space<vmem>>, %arg4: memref<1x384xf32, #tpu.memory_space<vmem>>, %arg5: memref<8x8x128xf32, #tpu.memory_space<vmem>>, %arg6: memref<8x128xf32, #tpu.memory_space<vmem>>) attributes {dimension_semantics = [#tpu.dimension_semantics<arbitrary>], iteration_bounds = array<i64: 1>, scalar_prefetch = 0 : i64, scratch_operands = 1 : i64, tpu.core_type = #tpu.core_type<tc>, window_params = [{transform_indices = @transform_0, window_bounds = array<i64: 8, 8, 384>}, {pipeline_mode = #tpu.pipeline_mode<synchronous>, transform_indices = @transform_1, window_bounds = array<i64: 8, 128>}, {pipeline_mode = #tpu.pipeline_mode<synchronous>, transform_indices = @transform_2, window_bounds = array<i64: 128, 384>}, {pipeline_mode = #tpu.pipeline_mode<synchronous>, transform_indices = @transform_3, window_bounds = array<i64: 1, 384>}, {transform_indices = @transform_4, window_bounds = array<i64: 8, 8, 128>}]} {
    %c0_i32 = arith.constant 0 : i32
    %0 = arith.cmpi eq, %arg0, %c0_i32 : i32
    %1 = arith.extui %0 : i1 to i32
    %c0_i32_0 = arith.constant 0 : i32
    %2 = arith.cmpi ne, %1, %c0_i32_0 : i32
    scf.if %2 {
      %c0_144 = arith.constant 0 : index
      %c0_145 = arith.constant 0 : index
      %355 = vector.load %arg2[%c0_144, %c0_145] : memref<8x128xf32, #tpu.memory_space<vmem>>, vector<8x128xf32>
      %c0_146 = arith.constant 0 : index
      %c0_147 = arith.constant 0 : index
      %356 = vector.load %arg6[%c0_146, %c0_147] : memref<8x128xf32, #tpu.memory_space<vmem>>, vector<8x128xf32>
      tpu.vector_store %arg6[%c0_146, %c0_147], %355 {strides = array<i32>} : memref<8x128xf32, #tpu.memory_space<vmem>>, vector<8x128xf32>,
    } else {
    }
    %c0_i32_1 = arith.constant 0 : i32
    %c8_i32 = arith.constant 8 : i32
    %3 = arith.muli %arg0, %c8_i32 : i32
    %4 = arith.addi %3, %c0_i32_1 : i32
    %c0 = arith.constant 0 : index
    %c0_2 = arith.constant 0 : index
    %5 = vector.load %arg6[%c0, %c0_2] : memref<8x128xf32, #tpu.memory_space<vmem>>, vector<8x128xf32>
    %c0_3 = arith.constant 0 : index
    %c0_4 = arith.constant 0 : index
    %6 = vector.load %arg3[%c0_3, %c0_4] : memref<128x384xf32, #tpu.memory_space<vmem>>, vector<128x384xf32>
    %cst = arith.constant dense<0.000000e+00> : vector<8x384xf32>
    %7 = tpu.matmul %5, %6, %cst {dimension_numbers = #tpu.dot_dimension_numbers<[1], [0], [0], [1], [0, 0, 1, 1], [], []>} : vector<8x128xf32>, vector<128x384xf32>, vector<8x384xf32> -> vector<8x384xf32>
    %c0_5 = arith.constant 0 : index
    %c0_6 = arith.constant 0 : index
    %8 = vector.load %arg4[%c0_5, %c0_6] : memref<1x384xf32, #tpu.memory_space<vmem>>, vector<1x384xf32>
    %9 = vector.broadcast %8 : vector<1x384xf32> to vector<8x384xf32>
    %10 = arith.addf %7, %9 : vector<8x384xf32>
    %11 = arith.index_cast %c0_i32_1 : i32 to index
    %c0_7 = arith.constant 0 : index
    %c0_8 = arith.constant 0 : index
    %12 = vector.load %arg1[%11, %c0_7, %c0_8] : memref<8x8x384xf32, #tpu.memory_space<vmem>>, vector<1x8x384xf32>
    %13 = vector.shape_cast %12 : vector<1x8x384xf32> to vector<8x384xf32>
    %14 = vector.extract_strided_slice %13 {offsets = [0, 0], sizes = [8, 128], strides = [1, 1]} : vector<8x384xf32> to vector<8x128xf32>
    %15 = vector.extract_strided_slice %10 {offsets = [0, 0], sizes = [8, 128], strides = [1, 1]} : vector<8x384xf32> to vector<8x128xf32>
    %16 = arith.addf %14, %15 : vector<8x128xf32>
    %17 = arith.negf %16 : vector<8x128xf32>
    %18 = math.exp %17 : vector<8x128xf32>
    %cst_9 = arith.constant 1.000000e+00 : f32
    %19 = vector.broadcast %cst_9 : f32 to vector<8x128xf32>
    %20 = arith.addf %19, %18 : vector<8x128xf32>
    %21 = arith.divf %19, %20 : vector<8x128xf32>
    %22 = vector.extract_strided_slice %13 {offsets = [0, 128], sizes = [8, 128], strides = [1, 1]} : vector<8x384xf32> to vector<8x128xf32>
    %23 = vector.extract_strided_slice %10 {offsets = [0, 128], sizes = [8, 128], strides = [1, 1]} : vector<8x384xf32> to vector<8x128xf32>
    %24 = arith.addf %22, %23 : vector<8x128xf32>
    %25 = arith.negf %24 : vector<8x128xf32>
    %26 = math.exp %25 : vector<8x128xf32>
    %cst_10 = arith.constant 1.000000e+00 : f32
    %27 = vector.broadcast %cst_10 : f32 to vector<8x128xf32>
    %28 = arith.addf %27, %26 : vector<8x128xf32>
    %29 = arith.divf %27, %28 : vector<8x128xf32>
    %30 = vector.extract_strided_slice %13 {offsets = [0, 256], sizes = [8, 128], strides = [1, 1]} : vector<8x384xf32> to vector<8x128xf32>
    %31 = vector.extract_strided_slice %10 {offsets = [0, 256], sizes = [8, 128], strides = [1, 1]} : vector<8x384xf32> to vector<8x128xf32>
    %32 = arith.mulf %21, %31 : vector<8x128xf32>
    %33 = arith.addf %30, %32 : vector<8x128xf32>
    %34 = math.tanh %33 : vector<8x128xf32>
    %cst_11 = arith.constant 1.000000e+00 : f32
    %35 = vector.broadcast %cst_11 : f32 to vector<8x128xf32>
    %36 = arith.subf %35, %29 : vector<8x128xf32>
    %37 = arith.mulf %36, %34 : vector<8x128xf32>
    %38 = arith.mulf %29, %5 : vector<8x128xf32>
    %39 = arith.addf %37, %38 : vector<8x128xf32>
    %c8_i32_12 = arith.constant 8 : i32
    %40 = arith.cmpi slt, %4, %c8_i32_12 : i32
    %41 = arith.select %40, %39, %5 : vector<8x128xf32>
    %c0_13 = arith.constant 0 : index
    %c0_14 = arith.constant 0 : index
    %42 = vector.load %arg6[%c0_13, %c0_14] : memref<8x128xf32, #tpu.memory_space<vmem>>, vector<8x128xf32>
    tpu.vector_store %arg6[%c0_13, %c0_14], %41 {strides = array<i32>} : memref<8x128xf32, #tpu.memory_space<vmem>>, vector<8x128xf32>,
    %43 = arith.index_cast %c0_i32_1 : i32 to index
    %c0_15 = arith.constant 0 : index
    %c0_16 = arith.constant 0 : index
    %44 = vector.load %arg5[%43, %c0_15, %c0_16] : memref<8x8x128xf32, #tpu.memory_space<vmem>>, vector<1x8x128xf32>
    %45 = vector.shape_cast %44 : vector<1x8x128xf32> to vector<8x128xf32>
    %46 = vector.shape_cast %41 : vector<8x128xf32> to vector<1x8x128xf32>
    tpu.vector_store %arg5[%43, %c0_15, %c0_16], %46 {strides = array<i32>} : memref<8x8x128xf32, #tpu.memory_space<vmem>>, vector<1x8x128xf32>,
    %c1_i32 = arith.constant 1 : i32
    %c8_i32_17 = arith.constant 8 : i32
    %47 = arith.muli %arg0, %c8_i32_17 : i32
    %48 = arith.addi %47, %c1_i32 : i32
    %c0_18 = arith.constant 0 : index
    %c0_19 = arith.constant 0 : index
    %49 = vector.load %arg6[%c0_18, %c0_19] : memref<8x128xf32, #tpu.memory_space<vmem>>, vector<8x128xf32>
    %c0_20 = arith.constant 0 : index
    %c0_21 = arith.constant 0 : index
    %50 = vector.load %arg3[%c0_20, %c0_21] : memref<128x384xf32, #tpu.memory_space<vmem>>, vector<128x384xf32>
    %cst_22 = arith.constant dense<0.000000e+00> : vector<8x384xf32>
    %51 = tpu.matmul %49, %50, %cst_22 {dimension_numbers = #tpu.dot_dimension_numbers<[1], [0], [0], [1], [0, 0, 1, 1], [], []>} : vector<8x128xf32>, vector<128x384xf32>, vector<8x384xf32> -> vector<8x384xf32>
    %c0_23 = arith.constant 0 : index
    %c0_24 = arith.constant 0 : index
    %52 = vector.load %arg4[%c0_23, %c0_24] : memref<1x384xf32, #tpu.memory_space<vmem>>, vector<1x384xf32>
    %53 = vector.broadcast %52 : vector<1x384xf32> to vector<8x384xf32>
    %54 = arith.addf %51, %53 : vector<8x384xf32>
    %55 = arith.index_cast %c1_i32 : i32 to index
    %c0_25 = arith.constant 0 : index
    %c0_26 = arith.constant 0 : index
    %56 = vector.load %arg1[%55, %c0_25, %c0_26] : memref<8x8x384xf32, #tpu.memory_space<vmem>>, vector<1x8x384xf32>
    %57 = vector.shape_cast %56 : vector<1x8x384xf32> to vector<8x384xf32>
    %58 = vector.extract_strided_slice %57 {offsets = [0, 0], sizes = [8, 128], strides = [1, 1]} : vector<8x384xf32> to vector<8x128xf32>
    %59 = vector.extract_strided_slice %54 {offsets = [0, 0], sizes = [8, 128], strides = [1, 1]} : vector<8x384xf32> to vector<8x128xf32>
    %60 = arith.addf %58, %59 : vector<8x128xf32>
    %61 = arith.negf %60 : vector<8x128xf32>
    %62 = math.exp %61 : vector<8x128xf32>
    %cst_27 = arith.constant 1.000000e+00 : f32
    %63 = vector.broadcast %cst_27 : f32 to vector<8x128xf32>
    %64 = arith.addf %63, %62 : vector<8x128xf32>
    %65 = arith.divf %63, %64 : vector<8x128xf32>
    %66 = vector.extract_strided_slice %57 {offsets = [0, 128], sizes = [8, 128], strides = [1, 1]} : vector<8x384xf32> to vector<8x128xf32>
    %67 = vector.extract_strided_slice %54 {offsets = [0, 128], sizes = [8, 128], strides = [1, 1]} : vector<8x384xf32> to vector<8x128xf32>
    %68 = arith.addf %66, %67 : vector<8x128xf32>
    %69 = arith.negf %68 : vector<8x128xf32>
    %70 = math.exp %69 : vector<8x128xf32>
    %cst_28 = arith.constant 1.000000e+00 : f32
    %71 = vector.broadcast %cst_28 : f32 to vector<8x128xf32>
    %72 = arith.addf %71, %70 : vector<8x128xf32>
    %73 = arith.divf %71, %72 : vector<8x128xf32>
    %74 = vector.extract_strided_slice %57 {offsets = [0, 256], sizes = [8, 128], strides = [1, 1]} : vector<8x384xf32> to vector<8x128xf32>
    %75 = vector.extract_strided_slice %54 {offsets = [0, 256], sizes = [8, 128], strides = [1, 1]} : vector<8x384xf32> to vector<8x128xf32>
    %76 = arith.mulf %65, %75 : vector<8x128xf32>
    %77 = arith.addf %74, %76 : vector<8x128xf32>
    %78 = math.tanh %77 : vector<8x128xf32>
    %cst_29 = arith.constant 1.000000e+00 : f32
    %79 = vector.broadcast %cst_29 : f32 to vector<8x128xf32>
    %80 = arith.subf %79, %73 : vector<8x128xf32>
    %81 = arith.mulf %80, %78 : vector<8x128xf32>
    %82 = arith.mulf %73, %49 : vector<8x128xf32>
    %83 = arith.addf %81, %82 : vector<8x128xf32>
    %c8_i32_30 = arith.constant 8 : i32
    %84 = arith.cmpi slt, %48, %c8_i32_30 : i32
    %85 = arith.select %84, %83, %49 : vector<8x128xf32>
    %c0_31 = arith.constant 0 : index
    %c0_32 = arith.constant 0 : index
    %86 = vector.load %arg6[%c0_31, %c0_32] : memref<8x128xf32, #tpu.memory_space<vmem>>, vector<8x128xf32>
    tpu.vector_store %arg6[%c0_31, %c0_32], %85 {strides = array<i32>} : memref<8x128xf32, #tpu.memory_space<vmem>>, vector<8x128xf32>,
    %87 = arith.index_cast %c1_i32 : i32 to index
    %c0_33 = arith.constant 0 : index
    %c0_34 = arith.constant 0 : index
    %88 = vector.load %arg5[%87, %c0_33, %c0_34] : memref<8x8x128xf32, #tpu.memory_space<vmem>>, vector<1x8x128xf32>
    %89 = vector.shape_cast %88 : vector<1x8x128xf32> to vector<8x128xf32>
    %90 = vector.shape_cast %85 : vector<8x128xf32> to vector<1x8x128xf32>
    tpu.vector_store %arg5[%87, %c0_33, %c0_34], %90 {strides = array<i32>} : memref<8x8x128xf32, #tpu.memory_space<vmem>>, vector<1x8x128xf32>,
    %c2_i32 = arith.constant 2 : i32
    %c8_i32_35 = arith.constant 8 : i32
    %91 = arith.muli %arg0, %c8_i32_35 : i32
    %92 = arith.addi %91, %c2_i32 : i32
    %c0_36 = arith.constant 0 : index
    %c0_37 = arith.constant 0 : index
    %93 = vector.load %arg6[%c0_36, %c0_37] : memref<8x128xf32, #tpu.memory_space<vmem>>, vector<8x128xf32>
    %c0_38 = arith.constant 0 : index
    %c0_39 = arith.constant 0 : index
    %94 = vector.load %arg3[%c0_38, %c0_39] : memref<128x384xf32, #tpu.memory_space<vmem>>, vector<128x384xf32>
    %cst_40 = arith.constant dense<0.000000e+00> : vector<8x384xf32>
    %95 = tpu.matmul %93, %94, %cst_40 {dimension_numbers = #tpu.dot_dimension_numbers<[1], [0], [0], [1], [0, 0, 1, 1], [], []>} : vector<8x128xf32>, vector<128x384xf32>, vector<8x384xf32> -> vector<8x384xf32>
    %c0_41 = arith.constant 0 : index
    %c0_42 = arith.constant 0 : index
    %96 = vector.load %arg4[%c0_41, %c0_42] : memref<1x384xf32, #tpu.memory_space<vmem>>, vector<1x384xf32>
    %97 = vector.broadcast %96 : vector<1x384xf32> to vector<8x384xf32>
    %98 = arith.addf %95, %97 : vector<8x384xf32>
    %99 = arith.index_cast %c2_i32 : i32 to index
    %c0_43 = arith.constant 0 : index
    %c0_44 = arith.constant 0 : index
    %100 = vector.load %arg1[%99, %c0_43, %c0_44] : memref<8x8x384xf32, #tpu.memory_space<vmem>>, vector<1x8x384xf32>
    %101 = vector.shape_cast %100 : vector<1x8x384xf32> to vector<8x384xf32>
    %102 = vector.extract_strided_slice %101 {offsets = [0, 0], sizes = [8, 128], strides = [1, 1]} : vector<8x384xf32> to vector<8x128xf32>
    %103 = vector.extract_strided_slice %98 {offsets = [0, 0], sizes = [8, 128], strides = [1, 1]} : vector<8x384xf32> to vector<8x128xf32>
    %104 = arith.addf %102, %103 : vector<8x128xf32>
    %105 = arith.negf %104 : vector<8x128xf32>
    %106 = math.exp %105 : vector<8x128xf32>
    %cst_45 = arith.constant 1.000000e+00 : f32
    %107 = vector.broadcast %cst_45 : f32 to vector<8x128xf32>
    %108 = arith.addf %107, %106 : vector<8x128xf32>
    %109 = arith.divf %107, %108 : vector<8x128xf32>
    %110 = vector.extract_strided_slice %101 {offsets = [0, 128], sizes = [8, 128], strides = [1, 1]} : vector<8x384xf32> to vector<8x128xf32>
    %111 = vector.extract_strided_slice %98 {offsets = [0, 128], sizes = [8, 128], strides = [1, 1]} : vector<8x384xf32> to vector<8x128xf32>
    %112 = arith.addf %110, %111 : vector<8x128xf32>
    %113 = arith.negf %112 : vector<8x128xf32>
    %114 = math.exp %113 : vector<8x128xf32>
    %cst_46 = arith.constant 1.000000e+00 : f32
    %115 = vector.broadcast %cst_46 : f32 to vector<8x128xf32>
    %116 = arith.addf %115, %114 : vector<8x128xf32>
    %117 = arith.divf %115, %116 : vector<8x128xf32>
    %118 = vector.extract_strided_slice %101 {offsets = [0, 256], sizes = [8, 128], strides = [1, 1]} : vector<8x384xf32> to vector<8x128xf32>
    %119 = vector.extract_strided_slice %98 {offsets = [0, 256], sizes = [8, 128], strides = [1, 1]} : vector<8x384xf32> to vector<8x128xf32>
    %120 = arith.mulf %109, %119 : vector<8x128xf32>
    %121 = arith.addf %118, %120 : vector<8x128xf32>
    %122 = math.tanh %121 : vector<8x128xf32>
    %cst_47 = arith.constant 1.000000e+00 : f32
    %123 = vector.broadcast %cst_47 : f32 to vector<8x128xf32>
    %124 = arith.subf %123, %117 : vector<8x128xf32>
    %125 = arith.mulf %124, %122 : vector<8x128xf32>
    %126 = arith.mulf %117, %93 : vector<8x128xf32>
    %127 = arith.addf %125, %126 : vector<8x128xf32>
    %c8_i32_48 = arith.constant 8 : i32
    %128 = arith.cmpi slt, %92, %c8_i32_48 : i32
    %129 = arith.select %128, %127, %93 : vector<8x128xf32>
    %c0_49 = arith.constant 0 : index
    %c0_50 = arith.constant 0 : index
    %130 = vector.load %arg6[%c0_49, %c0_50] : memref<8x128xf32, #tpu.memory_space<vmem>>, vector<8x128xf32>
    tpu.vector_store %arg6[%c0_49, %c0_50], %129 {strides = array<i32>} : memref<8x128xf32, #tpu.memory_space<vmem>>, vector<8x128xf32>,
    %131 = arith.index_cast %c2_i32 : i32 to index
    %c0_51 = arith.constant 0 : index
    %c0_52 = arith.constant 0 : index
    %132 = vector.load %arg5[%131, %c0_51, %c0_52] : memref<8x8x128xf32, #tpu.memory_space<vmem>>, vector<1x8x128xf32>
    %133 = vector.shape_cast %132 : vector<1x8x128xf32> to vector<8x128xf32>
    %134 = vector.shape_cast %129 : vector<8x128xf32> to vector<1x8x128xf32>
    tpu.vector_store %arg5[%131, %c0_51, %c0_52], %134 {strides = array<i32>} : memref<8x8x128xf32, #tpu.memory_space<vmem>>, vector<1x8x128xf32>,
    %c3_i32 = arith.constant 3 : i32
    %c8_i32_53 = arith.constant 8 : i32
    %135 = arith.muli %arg0, %c8_i32_53 : i32
    %136 = arith.addi %135, %c3_i32 : i32
    %c0_54 = arith.constant 0 : index
    %c0_55 = arith.constant 0 : index
    %137 = vector.load %arg6[%c0_54, %c0_55] : memref<8x128xf32, #tpu.memory_space<vmem>>, vector<8x128xf32>
    %c0_56 = arith.constant 0 : index
    %c0_57 = arith.constant 0 : index
    %138 = vector.load %arg3[%c0_56, %c0_57] : memref<128x384xf32, #tpu.memory_space<vmem>>, vector<128x384xf32>
    %cst_58 = arith.constant dense<0.000000e+00> : vector<8x384xf32>
    %139 = tpu.matmul %137, %138, %cst_58 {dimension_numbers = #tpu.dot_dimension_numbers<[1], [0], [0], [1], [0, 0, 1, 1], [], []>} : vector<8x128xf32>, vector<128x384xf32>, vector<8x384xf32> -> vector<8x384xf32>
    %c0_59 = arith.constant 0 : index
    %c0_60 = arith.constant 0 : index
    %140 = vector.load %arg4[%c0_59, %c0_60] : memref<1x384xf32, #tpu.memory_space<vmem>>, vector<1x384xf32>
    %141 = vector.broadcast %140 : vector<1x384xf32> to vector<8x384xf32>
    %142 = arith.addf %139, %141 : vector<8x384xf32>
    %143 = arith.index_cast %c3_i32 : i32 to index
    %c0_61 = arith.constant 0 : index
    %c0_62 = arith.constant 0 : index
    %144 = vector.load %arg1[%143, %c0_61, %c0_62] : memref<8x8x384xf32, #tpu.memory_space<vmem>>, vector<1x8x384xf32>
    %145 = vector.shape_cast %144 : vector<1x8x384xf32> to vector<8x384xf32>
    %146 = vector.extract_strided_slice %145 {offsets = [0, 0], sizes = [8, 128], strides = [1, 1]} : vector<8x384xf32> to vector<8x128xf32>
    %147 = vector.extract_strided_slice %142 {offsets = [0, 0], sizes = [8, 128], strides = [1, 1]} : vector<8x384xf32> to vector<8x128xf32>
    %148 = arith.addf %146, %147 : vector<8x128xf32>
    %149 = arith.negf %148 : vector<8x128xf32>
    %150 = math.exp %149 : vector<8x128xf32>
    %cst_63 = arith.constant 1.000000e+00 : f32
    %151 = vector.broadcast %cst_63 : f32 to vector<8x128xf32>
    %152 = arith.addf %151, %150 : vector<8x128xf32>
    %153 = arith.divf %151, %152 : vector<8x128xf32>
    %154 = vector.extract_strided_slice %145 {offsets = [0, 128], sizes = [8, 128], strides = [1, 1]} : vector<8x384xf32> to vector<8x128xf32>
    %155 = vector.extract_strided_slice %142 {offsets = [0, 128], sizes = [8, 128], strides = [1, 1]} : vector<8x384xf32> to vector<8x128xf32>
    %156 = arith.addf %154, %155 : vector<8x128xf32>
    %157 = arith.negf %156 : vector<8x128xf32>
    %158 = math.exp %157 : vector<8x128xf32>
    %cst_64 = arith.constant 1.000000e+00 : f32
    %159 = vector.broadcast %cst_64 : f32 to vector<8x128xf32>
    %160 = arith.addf %159, %158 : vector<8x128xf32>
    %161 = arith.divf %159, %160 : vector<8x128xf32>
    %162 = vector.extract_strided_slice %145 {offsets = [0, 256], sizes = [8, 128], strides = [1, 1]} : vector<8x384xf32> to vector<8x128xf32>
    %163 = vector.extract_strided_slice %142 {offsets = [0, 256], sizes = [8, 128], strides = [1, 1]} : vector<8x384xf32> to vector<8x128xf32>
    %164 = arith.mulf %153, %163 : vector<8x128xf32>
    %165 = arith.addf %162, %164 : vector<8x128xf32>
    %166 = math.tanh %165 : vector<8x128xf32>
    %cst_65 = arith.constant 1.000000e+00 : f32
    %167 = vector.broadcast %cst_65 : f32 to vector<8x128xf32>
    %168 = arith.subf %167, %161 : vector<8x128xf32>
    %169 = arith.mulf %168, %166 : vector<8x128xf32>
    %170 = arith.mulf %161, %137 : vector<8x128xf32>
    %171 = arith.addf %169, %170 : vector<8x128xf32>
    %c8_i32_66 = arith.constant 8 : i32
    %172 = arith.cmpi slt, %136, %c8_i32_66 : i32
    %173 = arith.select %172, %171, %137 : vector<8x128xf32>
    %c0_67 = arith.constant 0 : index
    %c0_68 = arith.constant 0 : index
    %174 = vector.load %arg6[%c0_67, %c0_68] : memref<8x128xf32, #tpu.memory_space<vmem>>, vector<8x128xf32>
    tpu.vector_store %arg6[%c0_67, %c0_68], %173 {strides = array<i32>} : memref<8x128xf32, #tpu.memory_space<vmem>>, vector<8x128xf32>,
    %175 = arith.index_cast %c3_i32 : i32 to index
    %c0_69 = arith.constant 0 : index
    %c0_70 = arith.constant 0 : index
    %176 = vector.load %arg5[%175, %c0_69, %c0_70] : memref<8x8x128xf32, #tpu.memory_space<vmem>>, vector<1x8x128xf32>
    %177 = vector.shape_cast %176 : vector<1x8x128xf32> to vector<8x128xf32>
    %178 = vector.shape_cast %173 : vector<8x128xf32> to vector<1x8x128xf32>
    tpu.vector_store %arg5[%175, %c0_69, %c0_70], %178 {strides = array<i32>} : memref<8x8x128xf32, #tpu.memory_space<vmem>>, vector<1x8x128xf32>,
    %c4_i32 = arith.constant 4 : i32
    %c8_i32_71 = arith.constant 8 : i32
    %179 = arith.muli %arg0, %c8_i32_71 : i32
    %180 = arith.addi %179, %c4_i32 : i32
    %c0_72 = arith.constant 0 : index
    %c0_73 = arith.constant 0 : index
    %181 = vector.load %arg6[%c0_72, %c0_73] : memref<8x128xf32, #tpu.memory_space<vmem>>, vector<8x128xf32>
    %c0_74 = arith.constant 0 : index
    %c0_75 = arith.constant 0 : index
    %182 = vector.load %arg3[%c0_74, %c0_75] : memref<128x384xf32, #tpu.memory_space<vmem>>, vector<128x384xf32>
    %cst_76 = arith.constant dense<0.000000e+00> : vector<8x384xf32>
    %183 = tpu.matmul %181, %182, %cst_76 {dimension_numbers = #tpu.dot_dimension_numbers<[1], [0], [0], [1], [0, 0, 1, 1], [], []>} : vector<8x128xf32>, vector<128x384xf32>, vector<8x384xf32> -> vector<8x384xf32>
    %c0_77 = arith.constant 0 : index
    %c0_78 = arith.constant 0 : index
    %184 = vector.load %arg4[%c0_77, %c0_78] : memref<1x384xf32, #tpu.memory_space<vmem>>, vector<1x384xf32>
    %185 = vector.broadcast %184 : vector<1x384xf32> to vector<8x384xf32>
    %186 = arith.addf %183, %185 : vector<8x384xf32>
    %187 = arith.index_cast %c4_i32 : i32 to index
    %c0_79 = arith.constant 0 : index
    %c0_80 = arith.constant 0 : index
    %188 = vector.load %arg1[%187, %c0_79, %c0_80] : memref<8x8x384xf32, #tpu.memory_space<vmem>>, vector<1x8x384xf32>
    %189 = vector.shape_cast %188 : vector<1x8x384xf32> to vector<8x384xf32>
    %190 = vector.extract_strided_slice %189 {offsets = [0, 0], sizes = [8, 128], strides = [1, 1]} : vector<8x384xf32> to vector<8x128xf32>
    %191 = vector.extract_strided_slice %186 {offsets = [0, 0], sizes = [8, 128], strides = [1, 1]} : vector<8x384xf32> to vector<8x128xf32>
    %192 = arith.addf %190, %191 : vector<8x128xf32>
    %193 = arith.negf %192 : vector<8x128xf32>
    %194 = math.exp %193 : vector<8x128xf32>
    %cst_81 = arith.constant 1.000000e+00 : f32
    %195 = vector.broadcast %cst_81 : f32 to vector<8x128xf32>
    %196 = arith.addf %195, %194 : vector<8x128xf32>
    %197 = arith.divf %195, %196 : vector<8x128xf32>
    %198 = vector.extract_strided_slice %189 {offsets = [0, 128], sizes = [8, 128], strides = [1, 1]} : vector<8x384xf32> to vector<8x128xf32>
    %199 = vector.extract_strided_slice %186 {offsets = [0, 128], sizes = [8, 128], strides = [1, 1]} : vector<8x384xf32> to vector<8x128xf32>
    %200 = arith.addf %198, %199 : vector<8x128xf32>
    %201 = arith.negf %200 : vector<8x128xf32>
    %202 = math.exp %201 : vector<8x128xf32>
    %cst_82 = arith.constant 1.000000e+00 : f32
    %203 = vector.broadcast %cst_82 : f32 to vector<8x128xf32>
    %204 = arith.addf %203, %202 : vector<8x128xf32>
    %205 = arith.divf %203, %204 : vector<8x128xf32>
    %206 = vector.extract_strided_slice %189 {offsets = [0, 256], sizes = [8, 128], strides = [1, 1]} : vector<8x384xf32> to vector<8x128xf32>
    %207 = vector.extract_strided_slice %186 {offsets = [0, 256], sizes = [8, 128], strides = [1, 1]} : vector<8x384xf32> to vector<8x128xf32>
    %208 = arith.mulf %197, %207 : vector<8x128xf32>
    %209 = arith.addf %206, %208 : vector<8x128xf32>
    %210 = math.tanh %209 : vector<8x128xf32>
    %cst_83 = arith.constant 1.000000e+00 : f32
    %211 = vector.broadcast %cst_83 : f32 to vector<8x128xf32>
    %212 = arith.subf %211, %205 : vector<8x128xf32>
    %213 = arith.mulf %212, %210 : vector<8x128xf32>
    %214 = arith.mulf %205, %181 : vector<8x128xf32>
    %215 = arith.addf %213, %214 : vector<8x128xf32>
    %c8_i32_84 = arith.constant 8 : i32
    %216 = arith.cmpi slt, %180, %c8_i32_84 : i32
    %217 = arith.select %216, %215, %181 : vector<8x128xf32>
    %c0_85 = arith.constant 0 : index
    %c0_86 = arith.constant 0 : index
    %218 = vector.load %arg6[%c0_85, %c0_86] : memref<8x128xf32, #tpu.memory_space<vmem>>, vector<8x128xf32>
    tpu.vector_store %arg6[%c0_85, %c0_86], %217 {strides = array<i32>} : memref<8x128xf32, #tpu.memory_space<vmem>>, vector<8x128xf32>,
    %219 = arith.index_cast %c4_i32 : i32 to index
    %c0_87 = arith.constant 0 : index
    %c0_88 = arith.constant 0 : index
    %220 = vector.load %arg5[%219, %c0_87, %c0_88] : memref<8x8x128xf32, #tpu.memory_space<vmem>>, vector<1x8x128xf32>
    %221 = vector.shape_cast %220 : vector<1x8x128xf32> to vector<8x128xf32>
    %222 = vector.shape_cast %217 : vector<8x128xf32> to vector<1x8x128xf32>
    tpu.vector_store %arg5[%219, %c0_87, %c0_88], %222 {strides = array<i32>} : memref<8x8x128xf32, #tpu.memory_space<vmem>>, vector<1x8x128xf32>,
    %c5_i32 = arith.constant 5 : i32
    %c8_i32_89 = arith.constant 8 : i32
    %223 = arith.muli %arg0, %c8_i32_89 : i32
    %224 = arith.addi %223, %c5_i32 : i32
    %c0_90 = arith.constant 0 : index
    %c0_91 = arith.constant 0 : index
    %225 = vector.load %arg6[%c0_90, %c0_91] : memref<8x128xf32, #tpu.memory_space<vmem>>, vector<8x128xf32>
    %c0_92 = arith.constant 0 : index
    %c0_93 = arith.constant 0 : index
    %226 = vector.load %arg3[%c0_92, %c0_93] : memref<128x384xf32, #tpu.memory_space<vmem>>, vector<128x384xf32>
    %cst_94 = arith.constant dense<0.000000e+00> : vector<8x384xf32>
    %227 = tpu.matmul %225, %226, %cst_94 {dimension_numbers = #tpu.dot_dimension_numbers<[1], [0], [0], [1], [0, 0, 1, 1], [], []>} : vector<8x128xf32>, vector<128x384xf32>, vector<8x384xf32> -> vector<8x384xf32>
    %c0_95 = arith.constant 0 : index
    %c0_96 = arith.constant 0 : index
    %228 = vector.load %arg4[%c0_95, %c0_96] : memref<1x384xf32, #tpu.memory_space<vmem>>, vector<1x384xf32>
    %229 = vector.broadcast %228 : vector<1x384xf32> to vector<8x384xf32>
    %230 = arith.addf %227, %229 : vector<8x384xf32>
    %231 = arith.index_cast %c5_i32 : i32 to index
    %c0_97 = arith.constant 0 : index
    %c0_98 = arith.constant 0 : index
    %232 = vector.load %arg1[%231, %c0_97, %c0_98] : memref<8x8x384xf32, #tpu.memory_space<vmem>>, vector<1x8x384xf32>
    %233 = vector.shape_cast %232 : vector<1x8x384xf32> to vector<8x384xf32>
    %234 = vector.extract_strided_slice %233 {offsets = [0, 0], sizes = [8, 128], strides = [1, 1]} : vector<8x384xf32> to vector<8x128xf32>
    %235 = vector.extract_strided_slice %230 {offsets = [0, 0], sizes = [8, 128], strides = [1, 1]} : vector<8x384xf32> to vector<8x128xf32>
    %236 = arith.addf %234, %235 : vector<8x128xf32>
    %237 = arith.negf %236 : vector<8x128xf32>
    %238 = math.exp %237 : vector<8x128xf32>
    %cst_99 = arith.constant 1.000000e+00 : f32
    %239 = vector.broadcast %cst_99 : f32 to vector<8x128xf32>
    %240 = arith.addf %239, %238 : vector<8x128xf32>
    %241 = arith.divf %239, %240 : vector<8x128xf32>
    %242 = vector.extract_strided_slice %233 {offsets = [0, 128], sizes = [8, 128], strides = [1, 1]} : vector<8x384xf32> to vector<8x128xf32>
    %243 = vector.extract_strided_slice %230 {offsets = [0, 128], sizes = [8, 128], strides = [1, 1]} : vector<8x384xf32> to vector<8x128xf32>
    %244 = arith.addf %242, %243 : vector<8x128xf32>
    %245 = arith.negf %244 : vector<8x128xf32>
    %246 = math.exp %245 : vector<8x128xf32>
    %cst_100 = arith.constant 1.000000e+00 : f32
    %247 = vector.broadcast %cst_100 : f32 to vector<8x128xf32>
    %248 = arith.addf %247, %246 : vector<8x128xf32>
    %249 = arith.divf %247, %248 : vector<8x128xf32>
    %250 = vector.extract_strided_slice %233 {offsets = [0, 256], sizes = [8, 128], strides = [1, 1]} : vector<8x384xf32> to vector<8x128xf32>
    %251 = vector.extract_strided_slice %230 {offsets = [0, 256], sizes = [8, 128], strides = [1, 1]} : vector<8x384xf32> to vector<8x128xf32>
    %252 = arith.mulf %241, %251 : vector<8x128xf32>
    %253 = arith.addf %250, %252 : vector<8x128xf32>
    %254 = math.tanh %253 : vector<8x128xf32>
    %cst_101 = arith.constant 1.000000e+00 : f32
    %255 = vector.broadcast %cst_101 : f32 to vector<8x128xf32>
    %256 = arith.subf %255, %249 : vector<8x128xf32>
    %257 = arith.mulf %256, %254 : vector<8x128xf32>
    %258 = arith.mulf %249, %225 : vector<8x128xf32>
    %259 = arith.addf %257, %258 : vector<8x128xf32>
    %c8_i32_102 = arith.constant 8 : i32
    %260 = arith.cmpi slt, %224, %c8_i32_102 : i32
    %261 = arith.select %260, %259, %225 : vector<8x128xf32>
    %c0_103 = arith.constant 0 : index
    %c0_104 = arith.constant 0 : index
    %262 = vector.load %arg6[%c0_103, %c0_104] : memref<8x128xf32, #tpu.memory_space<vmem>>, vector<8x128xf32>
    tpu.vector_store %arg6[%c0_103, %c0_104], %261 {strides = array<i32>} : memref<8x128xf32, #tpu.memory_space<vmem>>, vector<8x128xf32>,
    %263 = arith.index_cast %c5_i32 : i32 to index
    %c0_105 = arith.constant 0 : index
    %c0_106 = arith.constant 0 : index
    %264 = vector.load %arg5[%263, %c0_105, %c0_106] : memref<8x8x128xf32, #tpu.memory_space<vmem>>, vector<1x8x128xf32>
    %265 = vector.shape_cast %264 : vector<1x8x128xf32> to vector<8x128xf32>
    %266 = vector.shape_cast %261 : vector<8x128xf32> to vector<1x8x128xf32>
    tpu.vector_store %arg5[%263, %c0_105, %c0_106], %266 {strides = array<i32>} : memref<8x8x128xf32, #tpu.memory_space<vmem>>, vector<1x8x128xf32>,
    %c6_i32 = arith.constant 6 : i32
    %c8_i32_107 = arith.constant 8 : i32
    %267 = arith.muli %arg0, %c8_i32_107 : i32
    %268 = arith.addi %267, %c6_i32 : i32
    %c0_108 = arith.constant 0 : index
    %c0_109 = arith.constant 0 : index
    %269 = vector.load %arg6[%c0_108, %c0_109] : memref<8x128xf32, #tpu.memory_space<vmem>>, vector<8x128xf32>
    %c0_110 = arith.constant 0 : index
    %c0_111 = arith.constant 0 : index
    %270 = vector.load %arg3[%c0_110, %c0_111] : memref<128x384xf32, #tpu.memory_space<vmem>>, vector<128x384xf32>
    %cst_112 = arith.constant dense<0.000000e+00> : vector<8x384xf32>
    %271 = tpu.matmul %269, %270, %cst_112 {dimension_numbers = #tpu.dot_dimension_numbers<[1], [0], [0], [1], [0, 0, 1, 1], [], []>} : vector<8x128xf32>, vector<128x384xf32>, vector<8x384xf32> -> vector<8x384xf32>
    %c0_113 = arith.constant 0 : index
    %c0_114 = arith.constant 0 : index
    %272 = vector.load %arg4[%c0_113, %c0_114] : memref<1x384xf32, #tpu.memory_space<vmem>>, vector<1x384xf32>
    %273 = vector.broadcast %272 : vector<1x384xf32> to vector<8x384xf32>
    %274 = arith.addf %271, %273 : vector<8x384xf32>
    %275 = arith.index_cast %c6_i32 : i32 to index
    %c0_115 = arith.constant 0 : index
    %c0_116 = arith.constant 0 : index
    %276 = vector.load %arg1[%275, %c0_115, %c0_116] : memref<8x8x384xf32, #tpu.memory_space<vmem>>, vector<1x8x384xf32>
    %277 = vector.shape_cast %276 : vector<1x8x384xf32> to vector<8x384xf32>
    %278 = vector.extract_strided_slice %277 {offsets = [0, 0], sizes = [8, 128], strides = [1, 1]} : vector<8x384xf32> to vector<8x128xf32>
    %279 = vector.extract_strided_slice %274 {offsets = [0, 0], sizes = [8, 128], strides = [1, 1]} : vector<8x384xf32> to vector<8x128xf32>
    %280 = arith.addf %278, %279 : vector<8x128xf32>
    %281 = arith.negf %280 : vector<8x128xf32>
    %282 = math.exp %281 : vector<8x128xf32>
    %cst_117 = arith.constant 1.000000e+00 : f32
    %283 = vector.broadcast %cst_117 : f32 to vector<8x128xf32>
    %284 = arith.addf %283, %282 : vector<8x128xf32>
    %285 = arith.divf %283, %284 : vector<8x128xf32>
    %286 = vector.extract_strided_slice %277 {offsets = [0, 128], sizes = [8, 128], strides = [1, 1]} : vector<8x384xf32> to vector<8x128xf32>
    %287 = vector.extract_strided_slice %274 {offsets = [0, 128], sizes = [8, 128], strides = [1, 1]} : vector<8x384xf32> to vector<8x128xf32>
    %288 = arith.addf %286, %287 : vector<8x128xf32>
    %289 = arith.negf %288 : vector<8x128xf32>
    %290 = math.exp %289 : vector<8x128xf32>
    %cst_118 = arith.constant 1.000000e+00 : f32
    %291 = vector.broadcast %cst_118 : f32 to vector<8x128xf32>
    %292 = arith.addf %291, %290 : vector<8x128xf32>
    %293 = arith.divf %291, %292 : vector<8x128xf32>
    %294 = vector.extract_strided_slice %277 {offsets = [0, 256], sizes = [8, 128], strides = [1, 1]} : vector<8x384xf32> to vector<8x128xf32>
    %295 = vector.extract_strided_slice %274 {offsets = [0, 256], sizes = [8, 128], strides = [1, 1]} : vector<8x384xf32> to vector<8x128xf32>
    %296 = arith.mulf %285, %295 : vector<8x128xf32>
    %297 = arith.addf %294, %296 : vector<8x128xf32>
    %298 = math.tanh %297 : vector<8x128xf32>
    %cst_119 = arith.constant 1.000000e+00 : f32
    %299 = vector.broadcast %cst_119 : f32 to vector<8x128xf32>
    %300 = arith.subf %299, %293 : vector<8x128xf32>
    %301 = arith.mulf %300, %298 : vector<8x128xf32>
    %302 = arith.mulf %293, %269 : vector<8x128xf32>
    %303 = arith.addf %301, %302 : vector<8x128xf32>
    %c8_i32_120 = arith.constant 8 : i32
    %304 = arith.cmpi slt, %268, %c8_i32_120 : i32
    %305 = arith.select %304, %303, %269 : vector<8x128xf32>
    %c0_121 = arith.constant 0 : index
    %c0_122 = arith.constant 0 : index
    %306 = vector.load %arg6[%c0_121, %c0_122] : memref<8x128xf32, #tpu.memory_space<vmem>>, vector<8x128xf32>
    tpu.vector_store %arg6[%c0_121, %c0_122], %305 {strides = array<i32>} : memref<8x128xf32, #tpu.memory_space<vmem>>, vector<8x128xf32>,
    %307 = arith.index_cast %c6_i32 : i32 to index
    %c0_123 = arith.constant 0 : index
    %c0_124 = arith.constant 0 : index
    %308 = vector.load %arg5[%307, %c0_123, %c0_124] : memref<8x8x128xf32, #tpu.memory_space<vmem>>, vector<1x8x128xf32>
    %309 = vector.shape_cast %308 : vector<1x8x128xf32> to vector<8x128xf32>
    %310 = vector.shape_cast %305 : vector<8x128xf32> to vector<1x8x128xf32>
    tpu.vector_store %arg5[%307, %c0_123, %c0_124], %310 {strides = array<i32>} : memref<8x8x128xf32, #tpu.memory_space<vmem>>, vector<1x8x128xf32>,
    %c7_i32 = arith.constant 7 : i32
    %c8_i32_125 = arith.constant 8 : i32
    %311 = arith.muli %arg0, %c8_i32_125 : i32
    %312 = arith.addi %311, %c7_i32 : i32
    %c0_126 = arith.constant 0 : index
    %c0_127 = arith.constant 0 : index
    %313 = vector.load %arg6[%c0_126, %c0_127] : memref<8x128xf32, #tpu.memory_space<vmem>>, vector<8x128xf32>
    %c0_128 = arith.constant 0 : index
    %c0_129 = arith.constant 0 : index
    %314 = vector.load %arg3[%c0_128, %c0_129] : memref<128x384xf32, #tpu.memory_space<vmem>>, vector<128x384xf32>
    %cst_130 = arith.constant dense<0.000000e+00> : vector<8x384xf32>
    %315 = tpu.matmul %313, %314, %cst_130 {dimension_numbers = #tpu.dot_dimension_numbers<[1], [0], [0], [1], [0, 0, 1, 1], [], []>} : vector<8x128xf32>, vector<128x384xf32>, vector<8x384xf32> -> vector<8x384xf32>
    %c0_131 = arith.constant 0 : index
    %c0_132 = arith.constant 0 : index
    %316 = vector.load %arg4[%c0_131, %c0_132] : memref<1x384xf32, #tpu.memory_space<vmem>>, vector<1x384xf32>
    %317 = vector.broadcast %316 : vector<1x384xf32> to vector<8x384xf32>
    %318 = arith.addf %315, %317 : vector<8x384xf32>
    %319 = arith.index_cast %c7_i32 : i32 to index
    %c0_133 = arith.constant 0 : index
    %c0_134 = arith.constant 0 : index
    %320 = vector.load %arg1[%319, %c0_133, %c0_134] : memref<8x8x384xf32, #tpu.memory_space<vmem>>, vector<1x8x384xf32>
    %321 = vector.shape_cast %320 : vector<1x8x384xf32> to vector<8x384xf32>
    %322 = vector.extract_strided_slice %321 {offsets = [0, 0], sizes = [8, 128], strides = [1, 1]} : vector<8x384xf32> to vector<8x128xf32>
    %323 = vector.extract_strided_slice %318 {offsets = [0, 0], sizes = [8, 128], strides = [1, 1]} : vector<8x384xf32> to vector<8x128xf32>
    %324 = arith.addf %322, %323 : vector<8x128xf32>
    %325 = arith.negf %324 : vector<8x128xf32>
    %326 = math.exp %325 : vector<8x128xf32>
    %cst_135 = arith.constant 1.000000e+00 : f32
    %327 = vector.broadcast %cst_135 : f32 to vector<8x128xf32>
    %328 = arith.addf %327, %326 : vector<8x128xf32>
    %329 = arith.divf %327, %328 : vector<8x128xf32>
    %330 = vector.extract_strided_slice %321 {offsets = [0, 128], sizes = [8, 128], strides = [1, 1]} : vector<8x384xf32> to vector<8x128xf32>
    %331 = vector.extract_strided_slice %318 {offsets = [0, 128], sizes = [8, 128], strides = [1, 1]} : vector<8x384xf32> to vector<8x128xf32>
    %332 = arith.addf %330, %331 : vector<8x128xf32>
    %333 = arith.negf %332 : vector<8x128xf32>
    %334 = math.exp %333 : vector<8x128xf32>
    %cst_136 = arith.constant 1.000000e+00 : f32
    %335 = vector.broadcast %cst_136 : f32 to vector<8x128xf32>
    %336 = arith.addf %335, %334 : vector<8x128xf32>
    %337 = arith.divf %335, %336 : vector<8x128xf32>
    %338 = vector.extract_strided_slice %321 {offsets = [0, 256], sizes = [8, 128], strides = [1, 1]} : vector<8x384xf32> to vector<8x128xf32>
    %339 = vector.extract_strided_slice %318 {offsets = [0, 256], sizes = [8, 128], strides = [1, 1]} : vector<8x384xf32> to vector<8x128xf32>
    %340 = arith.mulf %329, %339 : vector<8x128xf32>
    %341 = arith.addf %338, %340 : vector<8x128xf32>
    %342 = math.tanh %341 : vector<8x128xf32>
    %cst_137 = arith.constant 1.000000e+00 : f32
    %343 = vector.broadcast %cst_137 : f32 to vector<8x128xf32>
    %344 = arith.subf %343, %337 : vector<8x128xf32>
    %345 = arith.mulf %344, %342 : vector<8x128xf32>
    %346 = arith.mulf %337, %313 : vector<8x128xf32>
    %347 = arith.addf %345, %346 : vector<8x128xf32>
    %c8_i32_138 = arith.constant 8 : i32
    %348 = arith.cmpi slt, %312, %c8_i32_138 : i32
    %349 = arith.select %348, %347, %313 : vector<8x128xf32>
    %c0_139 = arith.constant 0 : index
    %c0_140 = arith.constant 0 : index
    %350 = vector.load %arg6[%c0_139, %c0_140] : memref<8x128xf32, #tpu.memory_space<vmem>>, vector<8x128xf32>
    tpu.vector_store %arg6[%c0_139, %c0_140], %349 {strides = array<i32>} : memref<8x128xf32, #tpu.memory_space<vmem>>, vector<8x128xf32>,
    %351 = arith.index_cast %c7_i32 : i32 to index
    %c0_141 = arith.constant 0 : index
    %c0_142 = arith.constant 0 : index
    %352 = vector.load %arg5[%351, %c0_141, %c0_142] : memref<8x8x128xf32, #tpu.memory_space<vmem>>, vector<1x8x128xf32>
    %353 = vector.shape_cast %352 : vector<1x8x128xf32> to vector<8x128xf32>
    %354 = vector.shape_cast %349 : vector<8x128xf32> to vector<1x8x128xf32>
    tpu.vector_store %arg5[%351, %c0_141, %c0_142], %354 {strides = array<i32>} : memref<8x8x128xf32, #tpu.memory_space<vmem>>, vector<1x8x128xf32>,
    %c8_i32_143 = arith.constant 8 : i32
    return
  }
  func.func @transform_0(%arg0: i32) -> (i32, i32, i32) {
    %c0_i32 = arith.constant 0 : i32
    %c0_i32_0 = arith.constant 0 : i32
    %c0_i32_1 = arith.constant 0 : i32
    return %arg0, %c0_i32, %c0_i32_0 : i32, i32, i32
  }
  func.func @transform_1(%arg0: i32) -> (i32, i32) {
    %c0_i32 = arith.constant 0 : i32
    %c0_i32_0 = arith.constant 0 : i32
    %c0_i32_1 = arith.constant 0 : i32
    return %c0_i32, %c0_i32_0 : i32, i32
  }
  func.func @transform_2(%arg0: i32) -> (i32, i32) {
    %c0_i32 = arith.constant 0 : i32
    %c0_i32_0 = arith.constant 0 : i32
    %c0_i32_1 = arith.constant 0 : i32
    return %c0_i32, %c0_i32_0 : i32, i32
  }
  func.func @transform_3(%arg0: i32) -> (i32, i32) {
    %c0_i32 = arith.constant 0 : i32
    %c0_i32_0 = arith.constant 0 : i32
    %c0_i32_1 = arith.constant 0 : i32
    return %c0_i32, %c0_i32_0 : i32, i32
  }
  func.func @transform_4(%arg0: i32) -> (i32, i32, i32) {
    %c0_i32 = arith.constant 0 : i32
    %c0_i32_0 = arith.constant 0 : i32
    %c0_i32_1 = arith.constant 0 : i32
    return %arg0, %c0_i32, %c0_i32_0 : i32, i32, i32
  }
}

</mosaic_0001>

<bundles_post_ra>
// kernel: gru_forward_pallas.2
= control target key start
LH: loop header
LB: loop body
LE: loop exit
PB: predicated region body
PF: predicated region fallthrough
CT: control target
= control target key end

     0   :  { %v466_v3 = vmov 0.0   ;;  %s758_s1 = inlined_call_operand.vmem [shape: f32[128,384], index: 1, kind: input, shape index: {}]   ;;  %s759_s0 = inlined_call_operand.vmem [shape: f32[64,128], index: 0, kind: input, shape index: {}]   ;;  %s760_s2 = inlined_call_operand.vmem [shape: f32[1,384], index: 2, kind: input, shape index: {}]   ;;  %s761_s3 = inlined_call_operand.vmem [shape: f32[64,384], index: 3, kind: output, shape index: {}]  }
   0x1   :  { %v23_v0 = vld [vmem:[%s758_s1 + $0x8] sm:$0xff]  ;;  %v26_v1 = vld [vmem:[%s758_s1 + $0x20] sm:$0xff]  ;;  %151 = vmatprep.mubr.f32.mxu0 %v466_v3  ;;  %v25_v5 = vld [vmem:[%s758_s1 + $0x18] sm:$0xff] }
   0x2   :  { %v22_v2 = vld [vmem:[%s758_s1] sm:$0xff]  ;;  %v401_v4 = vpack.c.bf16 %v26_v1, %v23_v0  ;;  %v29_v6 = vld [vmem:[%s758_s1 + $0x38] sm:$0xff]  ;;  %v32_v7 = vld [vmem:[%s758_s1 + $0x50] sm:$0xff] }
   0x3   :  { %v403_v8 = vpack.c.bf16 %v25_v5, %v22_v2  ;;  %v405_v9 = vpack.c.bf16 %v32_v7, %v29_v6  ;;  %v28_v10 = vld [vmem:[%s758_s1 + $0x30] sm:$0xff]  ;;  %v31_v11 = vld [vmem:[%s758_s1 + $0x48] sm:$0xff]  ;;  %v38_v13 = vld [vmem:[%s758_s1 + $0x80] sm:$0xff] }
   0x4   :  { %v35_v12 = vld [vmem:[%s758_s1 + $0x68] sm:$0xff]  ;;  %402 = vmatprep.subr.bf16.mxu0 %v401_v4  ;;  %v407_v14 = vpack.c.bf16 %v31_v11, %v28_v10  ;;  %v34_v15 = vld [vmem:[%s758_s1 + $0x60] sm:$0xff]  ;;  %v37_v17 = vld [vmem:[%s758_s1 + $0x78] sm:$0xff] }
   0x5   :  { %404 = vmatpush1.bf16.msra.mxu0 %v403_v8  ;;  %v409_v16 = vpack.c.bf16 %v38_v13, %v35_v12  ;;  %v24_v18 = vld [vmem:[%s758_s1 + $0x10] sm:$0xff]  ;;  %v27_v19 = vld [vmem:[%s758_s1 + $0x28] sm:$0xff]  ;;  %v41_v20 = vld [vmem:[%s758_s1 + $0x98] sm:$0xff]  ;;  %v411_v25 = vpack.c.bf16 %v37_v17, %v34_v15 }
   0x6   :  { %406 = vmatprep.subr.bf16.mxu0 %v405_v9  ;;  %v44_v21 = vld [vmem:[%s758_s1 + $0xb0] sm:$0xff]  ;;  %v433_v22 = vpack.c.bf16 %v27_v19, %v24_v18  ;;  %v30_v23 = vld [vmem:[%s758_s1 + $0x40] sm:$0xff]  ;;  %v33_v24 = vld [vmem:[%s758_s1 + $0x58] sm:$0xff]  ;;  %v72_v18 = vlaneseq }
   0x7   :  { %v40_v26 = vld [vmem:[%s758_s1 + $0x90] sm:$0xff]  ;;  %v437_v27 = vpack.c.bf16 %v33_v24, %v30_v23  ;;  %v413_v28 = vpack.c.bf16 %v44_v21, %v41_v20  ;;  %v43_v29 = vld [vmem:[%s758_s1 + $0xa8] sm:$0xff]  ;;  %v50_v33 = vld [vmem:[%s758_s1 + $0xe0] sm:$0xff] }
   0x8   :  { %434 = vmatprep.subr.bf16.mxu1 %v433_v22  ;;  %v36_v30 = vld [vmem:[%s758_s1 + $0x70] sm:$0xff]  ;;  %v39_v31 = vld [vmem:[%s758_s1 + $0x88] sm:$0xff]  ;;  %v42_v35 = vld [vmem:[%s758_s1 + $0xa0] sm:$0xff]  ;;  %v415_v37 = vpack.c.bf16 %v43_v29, %v40_v26  ;;  %v73_v19 = vshrl.u32 %v72_v18, 7 }
   0x9   :  { %408 = vmatpush1.bf16.msra.mxu0 %v407_v14  ;;  %436 = vmatpush3.bf16.msra.mxu1 %v433_v22  ;;  %v47_v32 = vld [vmem:[%s758_s1 + $0xc8] sm:$0xff]  ;;  %v441_v34 = vpack.c.bf16 %v39_v31, %v36_v30  ;;  %v45_v36 = vld [vmem:[%s758_s1 + $0xb8] sm:$0xff]  ;;  %v46_v39 = vld [vmem:[%s758_s1 + $0xc0] sm:$0xff] }
   0xa   :  { %410 = vmatprep.subr.bf16.mxu0 %v409_v16  ;;  %438 = vmatprep.subr.bf16.mxu1 %v437_v27  ;;  %v417_v38 = vpack.c.bf16 %v50_v33, %v47_v32  ;;  %v49_v40 = vld [vmem:[%s758_s1 + $0xd8] sm:$0xff]  ;;  %v56_v42 = vld [vmem:[%s758_s1 + $0x110] sm:$0xff]  ;;  %v445_v43 = vpack.c.bf16 %v45_v36, %v42_v35  ;;  %v14_v44 = vld [vmem:[%s759_s0] sm:$0xff]  ;;  %v74_v20 = vsub.s32 0, %v73_v19  ;;  %v78_v22 = vsub.s32 1, %v73_v19 }
   0xb   :  { %v53_v41 = vld [vmem:[%s758_s1 + $0xf8] sm:$0xff]  ;;  %v48_v45 = vld [vmem:[%s758_s1 + $0xd0] sm:$0xff]  ;;  %v51_v46 = vld [vmem:[%s758_s1 + $0xe8] sm:$0xff]  ;;  %389 = vmatprep.mubr.f32.mxu1 %v14_v44  ;;  %v419_v47 = vpack.c.bf16 %v49_v40, %v46_v39 }
   0xc   :  { %v421_v48 = vpack.c.bf16 %v56_v42, %v53_v41  ;;  %v52_v49 = vld [vmem:[%s758_s1 + $0xf0] sm:$0xff]  ;;  %v55_v50 = vld [vmem:[%s758_s1 + $0x108] sm:$0xff]  ;;  %v62_v52 = vld [vmem:[%s758_s1 + $0x140] sm:$0xff]  ;;  %v449_v53 = vpack.c.bf16 %v51_v46, %v48_v45 }
   0xd   :  { %412 = vmatpush1.bf16.msra.mxu0 %v411_v25  ;;  %440 = vmatpush3.bf16.msra.mxu1 %v437_v27  ;;  %v59_v51 = vld [vmem:[%s758_s1 + $0x128] sm:$0xff]  ;;  %v54_v54 = vld [vmem:[%s758_s1 + $0x100] sm:$0xff]  ;;  %v57_v55 = vld [vmem:[%s758_s1 + $0x118] sm:$0xff]  ;;  %v423_v56 = vpack.c.bf16 %v55_v50, %v52_v49  ;;  %v82_v25 = vsub.s32 2, %v73_v19 }
   0xe   :  { %414 = vmatprep.subr.bf16.mxu0 %v413_v28  ;;  %442 = vmatprep.subr.bf16.mxu1 %v441_v34  ;;  %v425_v57 = vpack.c.bf16 %v62_v52, %v59_v51  ;;  %v58_v58 = vld [vmem:[%s758_s1 + $0x120] sm:$0xff]  ;;  %v61_v59 = vld [vmem:[%s758_s1 + $0x138] sm:$0xff]  ;;  %v68_v61 = vld [vmem:[%s758_s1 + $0x170] sm:$0xff]  ;;  %v453_v62 = vpack.c.bf16 %v57_v55, %v54_v54 }
   0xf   :  { %v65_v60 = vld [vmem:[%s758_s1 + $0x158] sm:$0xff]  ;;  %v60_v63 = vld [vmem:[%s758_s1 + $0x130] sm:$0xff]  ;;  %v63_v0 = vld [vmem:[%s758_s1 + $0x148] sm:$0xff]  ;;  %v427_v1 = vpack.c.bf16 %v61_v59, %v58_v58 }
  0x10   :  { %v429_v2 = vpack.c.bf16 %v68_v61, %v65_v60  ;;  %v64_v4 = vld [vmem:[%s758_s1 + $0x150] sm:$0xff]  ;;  %v67_v5 = vld [vmem:[%s758_s1 + $0x168] sm:$0xff]  ;;  %v457_v6 = vpack.c.bf16 %v63_v0, %v60_v63  ;;  %v66_v7 = vld [vmem:[%s758_s1 + $0x160] sm:$0xff] }
  0x11   :  { %416 = vmatpush1.bf16.msra.mxu0 %v415_v37  ;;  %444 = vmatpush3.bf16.msra.mxu1 %v441_v34  ;;  %v69_v8 = vld [vmem:[%s758_s1 + $0x178] sm:$0xff]  ;;  %v431_v9 = vpack.c.bf16 %v67_v5, %v64_v4  ;;  %v15_v11 = vld [vmem:[%s759_s0 + $0x8] sm:$0xff]  ;;  %v16_v12 = vld [vmem:[%s759_s0 + $0x10] sm:$0xff] }
  0x12   :  { %418 = vmatprep.subr.bf16.mxu0 %v417_v38  ;;  %446 = vmatprep.subr.bf16.mxu1 %v445_v43  ;;  %v461_v10 = vpack.c.bf16 %v69_v8, %v66_v7  ;;  %v17_v13 = vld [vmem:[%s759_s0 + $0x18] sm:$0xff]  ;;  %v18_v14 = vld [vmem:[%s759_s0 + $0x20] sm:$0xff]  ;;  %v19_v15 = vld [vmem:[%s759_s0 + $0x28] sm:$0xff] }
  0x13   :  { %v20_v16 = vld [vmem:[%s759_s0 + $0x30] sm:$0xff]  ;;  %v21_v17 = vld [vmem:[%s759_s0 + $0x38] sm:$0xff]  ;;  %v70_v21 = vld [vmem:[%s760_s2] sm:$0x7] }
  0x14   :  { %v666_v23 = vrot.slane %v70_v21, %v74_v20  ;;  %v668_v24 = vrot.slane %v70_v21, %v78_v22  ;;  %v83_v29 = vrot.slane %v70_v21, %v82_v25 }
  0x15   :  { %420 = vmatpush1.bf16.msra.mxu0 %v419_v47  ;;  %448 = vmatpush3.bf16.msra.mxu1 %v445_v43 }
  0x16   :  { %422 = vmatprep.subr.bf16.mxu0 %v421_v48  ;;  %450 = vmatprep.subr.bf16.mxu1 %v449_v53 }
  0x19   :  { %424 = vmatpush1.bf16.msra.mxu0 %v423_v56  ;;  %452 = vmatpush3.bf16.msra.mxu1 %v449_v53 }
  0x1a   :  { %426 = vmatprep.subr.bf16.mxu0 %v425_v57  ;;  %454 = vmatprep.subr.bf16.mxu1 %v453_v62 }
  0x1d   :  { %428 = vmatpush1.bf16.msra.mxu0 %v427_v1  ;;  %456 = vmatpush3.bf16.msra.mxu1 %v453_v62 }
  0x1e   :  { %430 = vmatprep.subr.bf16.mxu0 %v429_v2  ;;  %458 = vmatprep.subr.bf16.mxu1 %v457_v6 }
  0x21   :  { %432 = vmatpush1.bf16.msra.mxu0 %v431_v9  ;;  %460 = vmatpush3.bf16.msra.mxu1 %v457_v6 }
  0x22   :  { %462 = vmatprep.subr.bf16.mxu1 %v461_v10 }
  0x24   :  { %152 = vmatmul.mubr.f32.vlgmr.msra.gmra.mrb[0].mxu0 %v14_v44 }
  0x25   :  { %157 = vmatprep.mubr.f32.mxu0 %v466_v3  ;;  %464 = vmatpush3.bf16.msra.mxu1 %v461_v10 }
  0x28   :  { %158 = vmatmul.mubr.f32.gmra.mrb[2].mxu0 %v15_v11  ;;  %390 = vmatmul.mubr.f32.vlgmr.msra.gmra.mrb[0].mxu1 %v15_v11 }
  0x29   :  { %163 = vmatprep.mubr.f32.mxu0 %v466_v3  ;;  %392 = vmatprep.mubr.f32.mxu1 %v16_v12 }
  0x2c   :  { %164 = vmatmul.mubr.f32.gmra.mrb[4].mxu0 %v16_v12  ;;  %393 = vmatmul.mubr.f32.gmra.mrb[2].mxu1 %v17_v13 }
  0x2d   :  { %169 = vmatprep.mubr.f32.mxu0 %v466_v3  ;;  %395 = vmatprep.mubr.f32.mxu1 %v18_v14 }
  0x30   :  { %170 = vmatmul.mubr.f32.gmra.mrb[6].mxu0 %v17_v13  ;;  %396 = vmatmul.mubr.f32.gmra.mrb[4].mxu1 %v19_v15 }
  0x31   :  { %175 = vmatprep.mubr.f32.mxu0 %v466_v3  ;;  %398 = vmatprep.mubr.f32.mxu1 %v20_v16 }
  0x34   :  { %176 = vmatmul.mubr.f32.gmra.mrb[8].mxu0 %v18_v14  ;;  %399 = vmatmul.mubr.f32.gmra.mrb[6].mxu1 %v21_v17 }
  0x35   :  { %181 = vmatprep.mubr.f32.mxu0 %v466_v3 }
  0x38   :  { %182 = vmatmul.mubr.f32.gmra.mrb[10].mxu0 %v19_v15 }
  0x39   :  { %187 = vmatprep.mubr.f32.mxu0 %v466_v3 }
  0x3c   :  { %188 = vmatmul.mubr.f32.gmra.mrb[12].mxu0 %v20_v16 }
  0x3d   :  { %193 = vmatprep.mubr.f32.mxu0 %v466_v3 }
  0x40   :  { %194 = vmatmul.mubr.f32.gmra.mrb[14].mxu0 %v21_v17 }
  0xf7   :  { %v153_v26 = vpop.f32.mrb[0].mxu0 }
  0xf8   :  { %v154_v27 = vadd.f32 %v153_v26, %v666_v23  ;;  %v155_v28 = vpop.f32.mrb[1].mxu0 }
  0xf9   :  { %v156_v3 = vadd.f32 %v155_v28, %v668_v24 }
  0xfa   :  { %305 = vst [vmem:[%s761_s3] sm:$0xff] %v154_v27 }
  0xfb   :  { %306 = vst [vmem:[%s761_s3 + $0x8] sm:$0xff] %v156_v3  ;;  %v159_v30 = vpop.f32.mrb[2].mxu0  ;;  %v391_v33 = vpop.f32.mrb[0].mxu1 }
  0xfc   :  { %v160_v31 = vadd.f32 %v159_v30, %v666_v23  ;;  %v161_v32 = vpop.f32.mrb[3].mxu0  ;;  %v272_v35 = vadd.f32 %v391_v33, %v83_v29  ;;  %v266_v36 = vpop.f32.mrb[1].mxu1 }
  0xfd   :  { %v162_v34 = vadd.f32 %v161_v32, %v668_v24  ;;  %v267_v37 = vadd.f32 %v266_v36, %v83_v29 }
  0xfe   :  { %308 = vst [vmem:[%s761_s3 + $0x18] sm:$0xff] %v160_v31  ;;  %310 = vst [vmem:[%s761_s3 + $0x28] sm:$0xff] %v272_v35 }
  0xff   :  { %309 = vst [vmem:[%s761_s3 + $0x20] sm:$0xff] %v162_v34  ;;  %v165_v38 = vpop.f32.mrb[4].mxu0  ;;  %307 = vst [vmem:[%s761_s3 + $0x10] sm:$0xff] %v267_v37  ;;  %v394_v41 = vpop.f32.mrb[2].mxu1 }
 0x100   :  { %v166_v39 = vadd.f32 %v165_v38, %v666_v23  ;;  %v167_v40 = vpop.f32.mrb[5].mxu0  ;;  %v282_v43 = vadd.f32 %v394_v41, %v83_v29  ;;  %v276_v44 = vpop.f32.mrb[3].mxu1 }
 0x101   :  { %v168_v42 = vadd.f32 %v167_v40, %v668_v24  ;;  %v277_v45 = vadd.f32 %v276_v44, %v83_v29 }
 0x102   :  { %311 = vst [vmem:[%s761_s3 + $0x30] sm:$0xff] %v166_v39  ;;  %316 = vst [vmem:[%s761_s3 + $0x58] sm:$0xff] %v282_v43 }
 0x103   :  { %312 = vst [vmem:[%s761_s3 + $0x38] sm:$0xff] %v168_v42  ;;  %v171_v46 = vpop.f32.mrb[6].mxu0  ;;  %313 = vst [vmem:[%s761_s3 + $0x40] sm:$0xff] %v277_v45  ;;  %v397_v49 = vpop.f32.mrb[4].mxu1 }
 0x104   :  { %v172_v47 = vadd.f32 %v171_v46, %v666_v23  ;;  %v173_v48 = vpop.f32.mrb[7].mxu0  ;;  %v292_v51 = vadd.f32 %v397_v49, %v83_v29  ;;  %v286_v52 = vpop.f32.mrb[5].mxu1 }
 0x105   :  { %v174_v50 = vadd.f32 %v173_v48, %v668_v24  ;;  %v287_v53 = vadd.f32 %v286_v52, %v83_v29 }
 0x106   :  { %314 = vst [vmem:[%s761_s3 + $0x48] sm:$0xff] %v172_v47  ;;  %322 = vst [vmem:[%s761_s3 + $0x88] sm:$0xff] %v292_v51 }
 0x107   :  { %315 = vst [vmem:[%s761_s3 + $0x50] sm:$0xff] %v174_v50  ;;  %v177_v54 = vpop.f32.mrb[8].mxu0  ;;  %319 = vst [vmem:[%s761_s3 + $0x70] sm:$0xff] %v287_v53  ;;  %v400_v57 = vpop.f32.mrb[6].mxu1 }
 0x108   :  { %v178_v55 = vadd.f32 %v177_v54, %v666_v23  ;;  %v179_v56 = vpop.f32.mrb[9].mxu0  ;;  %v302_v59 = vadd.f32 %v400_v57, %v83_v29  ;;  %v296_v60 = vpop.f32.mrb[7].mxu1 }
 0x109   :  { %v180_v58 = vadd.f32 %v179_v56, %v668_v24  ;;  %v297_v61 = vadd.f32 %v296_v60, %v83_v29 }
 0x10a   :  { %317 = vst [vmem:[%s761_s3 + $0x60] sm:$0xff] %v178_v55  ;;  %328 = vst [vmem:[%s761_s3 + $0xb8] sm:$0xff] %v302_v59 }
 0x10b   :  { %318 = vst [vmem:[%s761_s3 + $0x68] sm:$0xff] %v180_v58  ;;  %v183_v62 = vpop.f32.mrb[10].mxu0  ;;  %325 = vst [vmem:[%s761_s3 + $0xa0] sm:$0xff] %v297_v61 }
 0x10c   :  { %v184_v63 = vadd.f32 %v183_v62, %v666_v23  ;;  %v185_v0 = vpop.f32.mrb[11].mxu0 }
 0x10d   :  { %v186_v1 = vadd.f32 %v185_v0, %v668_v24 }
 0x10e   :  { %320 = vst [vmem:[%s761_s3 + $0x78] sm:$0xff] %v184_v63 }
 0x10f   :  { %321 = vst [vmem:[%s761_s3 + $0x80] sm:$0xff] %v186_v1  ;;  %v189_v2 = vpop.f32.mrb[12].mxu0 }
 0x110   :  { %v190_v4 = vadd.f32 %v189_v2, %v666_v23  ;;  %v191_v5 = vpop.f32.mrb[13].mxu0 }
 0x111   :  { %v192_v6 = vadd.f32 %v191_v5, %v668_v24 }
 0x112   :  { %323 = vst [vmem:[%s761_s3 + $0x90] sm:$0xff] %v190_v4 }
 0x113   :  { %324 = vst [vmem:[%s761_s3 + $0x98] sm:$0xff] %v192_v6  ;;  %v195_v7 = vpop.f32.mrb[14].mxu0 }
 0x114   :  { %v196_v8 = vadd.f32 %v195_v7, %v666_v23  ;;  %v197_v9 = vpop.f32.mrb[15].mxu0 }
 0x115   :  { %v198_v10 = vadd.f32 %v197_v9, %v668_v24 }
 0x116   :  { %326 = vst [vmem:[%s761_s3 + $0xa8] sm:$0xff] %v196_v8 }
 0x117   :  { %327 = vst [vmem:[%s761_s3 + $0xb0] sm:$0xff] %v198_v10 }

// kernel: gru_forward_pallas.3
= control target key start
LH: loop header
LB: loop body
LE: loop exit
PB: predicated region body
PF: predicated region fallthrough
CT: control target
= control target key end

     0   :  { %v2944_v3 = vmov 0.0|0.0   ;;  %v2945_v4 = vmov 0.0   ;;  %vm2946_vm0 = vmmov 0   ;;  %s3830_s2 = inlined_call_operand.vmem [shape: f32[128,384], index: 2, kind: input, shape index: {}]   ;;  %s3831_s1 = inlined_call_operand.vmem [shape: f32[8,128], index: 1, kind: input, shape index: {}]   ;;  %s3832_s3 = inlined_call_operand.vmem [shape: f32[1,384], index: 3, kind: input, shape index: {}]   ;;  %s3833_s0 = inlined_call_operand.vmem [shape: f32[8,8,384], index: 0, kind: input, shape index: {}]   ;;  %s3834_s4 = inlined_call_operand.vmem [shape: f32[8,8,128], index: 4, kind: output, shape index: {}]  }
   0x1   :  { %v26_v0 = vld [vmem:[%s3830_s2 + $0x8] sm:$0xff]  ;;  %v29_v1 = vld [vmem:[%s3830_s2 + $0x20] sm:$0xff]  ;;  %2445 = vmatprep.subr.bf16.mxu1 %v2944_v3  ;;  %154 = vmatprep.mubr.f32.mxu0 %v2945_v4  ;;  %v28_v6 = vld [vmem:[%s3830_s2 + $0x18] sm:$0xff] }
   0x2   :  { %v25_v2 = vld [vmem:[%s3830_s2] sm:$0xff]  ;;  %v2983_v5 = vpack.c.bf16 %v29_v1, %v26_v0  ;;  %v32_v7 = vld [vmem:[%s3830_s2 + $0x38] sm:$0xff]  ;;  %v35_v8 = vld [vmem:[%s3830_s2 + $0x50] sm:$0xff]  ;;  %2165 = vmatprep.mubr.msk.f32.mxu1 %vm2946_vm0, %v2945_v4 }
   0x3   :  { %v2996_v9 = vpack.c.bf16 %v28_v6, %v25_v2  ;;  %v2998_v10 = vpack.c.bf16 %v35_v8, %v32_v7  ;;  %v31_v11 = vld [vmem:[%s3830_s2 + $0x30] sm:$0xff]  ;;  %v34_v12 = vld [vmem:[%s3830_s2 + $0x48] sm:$0xff]  ;;  %v41_v14 = vld [vmem:[%s3830_s2 + $0x80] sm:$0xff] }
   0x4   :  { %v38_v13 = vld [vmem:[%s3830_s2 + $0x68] sm:$0xff]  ;;  %2414 = vmatprep.subr.bf16.mxu0 %v2983_v5  ;;  %v3014_v15 = vpack.c.bf16 %v34_v12, %v31_v11  ;;  %v37_v17 = vld [vmem:[%s3830_s2 + $0x60] sm:$0xff]  ;;  %v40_v18 = vld [vmem:[%s3830_s2 + $0x78] sm:$0xff] }
   0x5   :  { %2416 = vmatpush1.bf16.msra.mxu0 %v2996_v9  ;;  %v3017_v16 = vpack.c.bf16 %v41_v14, %v38_v13  ;;  %v44_v19 = vld [vmem:[%s3830_s2 + $0x98] sm:$0xff]  ;;  %v47_v20 = vld [vmem:[%s3830_s2 + $0xb0] sm:$0xff]  ;;  %v3032_v21 = vpack.c.bf16 %v40_v18, %v37_v17  ;;  %v46_v24 = vld [vmem:[%s3830_s2 + $0xa8] sm:$0xff]  ;;  %v75_v18 = vlaneseq }
   0x6   :  { %2418 = vmatprep.subr.bf16.mxu0 %v2998_v10  ;;  %v3035_v22 = vpack.c.bf16 %v47_v20, %v44_v19  ;;  %v43_v23 = vld [vmem:[%s3830_s2 + $0x90] sm:$0xff]  ;;  %v50_v25 = vld [vmem:[%s3830_s2 + $0xc8] sm:$0xff]  ;;  %v53_v26 = vld [vmem:[%s3830_s2 + $0xe0] sm:$0xff] }
   0x7   :  { %v27_v27 = vld [vmem:[%s3830_s2 + $0x10] sm:$0xff]  ;;  %v30_v28 = vld [vmem:[%s3830_s2 + $0x28] sm:$0xff]  ;;  %v33_v30 = vld [vmem:[%s3830_s2 + $0x40] sm:$0xff]  ;;  %v3061_v31 = vpack.c.bf16 %v46_v24, %v43_v23  ;;  %v3067_v33 = vpack.c.bf16 %v53_v26, %v50_v25  ;;  %v76_v19 = vshrl.u32 %v75_v18, 7 }
   0x8   :  { %v3055_v29 = vpack.c.bf16 %v30_v28, %v27_v27  ;;  %v36_v32 = vld [vmem:[%s3830_s2 + $0x58] sm:$0xff]  ;;  %v49_v34 = vld [vmem:[%s3830_s2 + $0xc0] sm:$0xff]  ;;  %v59_v38 = vld [vmem:[%s3830_s2 + $0x110] sm:$0xff] }
   0x9   :  { %2420 = vmatpush1.bf16.msra.mxu0 %v3014_v15  ;;  %v52_v35 = vld [vmem:[%s3830_s2 + $0xd8] sm:$0xff]  ;;  %v3079_v37 = vpack.c.bf16 %v36_v32, %v33_v30  ;;  %v39_v39 = vld [vmem:[%s3830_s2 + $0x70] sm:$0xff]  ;;  %v42_v40 = vld [vmem:[%s3830_s2 + $0x88] sm:$0xff]  ;;  %v3243_v20 = vsub.s32 0, %v76_v19  ;;  %v3248_v24 = vsub.s32 1, %v76_v19 }
   0xa   :  { %2422 = vmatprep.subr.bf16.mxu0 %v3017_v16  ;;  %v56_v36 = vld [vmem:[%s3830_s2 + $0xf8] sm:$0xff]  ;;  %2447 = vmatpush3.bf16.msra.mxu1 %v3055_v29  ;;  %v3092_v41 = vpack.c.bf16 %v52_v35, %v49_v34  ;;  %v55_v43 = vld [vmem:[%s3830_s2 + $0xf0] sm:$0xff]  ;;  %v58_v44 = vld [vmem:[%s3830_s2 + $0x108] sm:$0xff]  ;;  %v3107_v46 = vpack.c.bf16 %v42_v40, %v39_v39 }
   0xb   :  { %2448 = vmatprep.subr.bf16.mxu1 %v2944_v3  ;;  %v3095_v42 = vpack.c.bf16 %v59_v38, %v56_v36  ;;  %v62_v45 = vld [vmem:[%s3830_s2 + $0x128] sm:$0xff]  ;;  %v65_v47 = vld [vmem:[%s3830_s2 + $0x140] sm:$0xff]  ;;  %v48_v49 = vld [vmem:[%s3830_s2 + $0xb8] sm:$0xff]  ;;  %v3120_v50 = vpack.c.bf16 %v58_v44, %v55_v43 }
   0xc   :  { %v45_v48 = vld [vmem:[%s3830_s2 + $0xa0] sm:$0xff]  ;;  %v3123_v51 = vpack.c.bf16 %v65_v47, %v62_v45  ;;  %v64_v53 = vld [vmem:[%s3830_s2 + $0x138] sm:$0xff]  ;;  %v71_v56 = vld [vmem:[%s3830_s2 + $0x170] sm:$0xff] }
   0xd   :  { %2424 = vmatpush1.bf16.msra.mxu0 %v3032_v21  ;;  %v61_v52 = vld [vmem:[%s3830_s2 + $0x120] sm:$0xff]  ;;  %v68_v54 = vld [vmem:[%s3830_s2 + $0x158] sm:$0xff]  ;;  %v3135_v55 = vpack.c.bf16 %v48_v49, %v45_v48  ;;  %v51_v57 = vld [vmem:[%s3830_s2 + $0xd0] sm:$0xff]  ;;  %v3258_v48 = vsub.s32 2, %v76_v19 }
   0xe   :  { %2426 = vmatprep.subr.bf16.mxu0 %v3035_v22  ;;  %2450 = vmatpush3.bf16.msra.mxu1 %v3079_v37  ;;  %v54_v58 = vld [vmem:[%s3830_s2 + $0xe8] sm:$0xff]  ;;  %v3148_v59 = vpack.c.bf16 %v64_v53, %v61_v52  ;;  %v3151_v60 = vpack.c.bf16 %v71_v56, %v68_v54  ;;  %v67_v61 = vld [vmem:[%s3830_s2 + $0x150] sm:$0xff]  ;;  %v57_v0 = vld [vmem:[%s3830_s2 + $0x100] sm:$0xff] }
   0xf   :  { %2451 = vmatprep.subr.bf16.mxu1 %v2944_v3  ;;  %v70_v62 = vld [vmem:[%s3830_s2 + $0x168] sm:$0xff]  ;;  %v3160_v63 = vpack.c.bf16 %v54_v58, %v51_v57  ;;  %v60_v1 = vld [vmem:[%s3830_s2 + $0x118] sm:$0xff]  ;;  %v63_v7 = vld [vmem:[%s3830_s2 + $0x130] sm:$0xff] }
  0x10   :  { %v3170_v2 = vpack.c.bf16 %v70_v62, %v67_v61  ;;  %v3174_v6 = vpack.c.bf16 %v60_v1, %v57_v0  ;;  %v66_v8 = vld [vmem:[%s3830_s2 + $0x148] sm:$0xff]  ;;  %v3187_v11 = vld [vmem:[%s3831_s1] sm:$0xff]  ;;  %v72_v14 = vld [vmem:[%s3830_s2 + $0x178] sm:$0xff] }
  0x11   :  { %2428 = vmatpush1.bf16.msra.mxu0 %v3061_v31  ;;  %v3190_v12 = vpack.c.bf16 %v66_v8, %v63_v7  ;;  %v69_v13 = vld [vmem:[%s3830_s2 + $0x160] sm:$0xff]  ;;  %v232_v36 = vld [vmem:[%s3833_s0 + $0x8] sm:$0xff]  ;;  %v233_v57 = vld [vmem:[%s3833_s0 + $0x10] sm:$0xff] }
  0x12   :  { %2430 = vmatprep.subr.bf16.mxu0 %v3067_v33  ;;  %2453 = vmatpush3.bf16.msra.mxu1 %v3107_v46  ;;  %v3204_v17 = vpack.c.bf16 %v72_v14, %v69_v13  ;;  %v73_v23 = vld [vmem:[%s3832_s3] sm:$0x7] }
  0x13   :  { %2454 = vmatprep.subr.bf16.mxu1 %v2944_v3  ;;  %v78_v25 = vrot.slane %v73_v23, %v3243_v20  ;;  %v82_v26 = vrot.slane %v73_v23, %v3248_v24  ;;  %v231_v28 = vld [vmem:[%s3833_s0] sm:$0xff]  ;;  %v86_v49 = vrot.slane %v73_v23, %v3258_v48  ;;  %v1955_v23 = vld [vmem:[%s3833_s0 + $0x18] sm:$0xff] }
  0x15   :  { %2432 = vmatpush1.bf16.msra.mxu0 %v3092_v41 }
  0x16   :  { %2434 = vmatprep.subr.bf16.mxu0 %v3095_v42  ;;  %2456 = vmatpush3.bf16.msra.mxu1 %v3135_v55 }
  0x17   :  { %2457 = vmatprep.subr.bf16.mxu1 %v2944_v3 }
  0x19   :  { %2436 = vmatpush1.bf16.msra.mxu0 %v3120_v50 }
  0x1a   :  { %2438 = vmatprep.subr.bf16.mxu0 %v3123_v51  ;;  %2459 = vmatpush3.bf16.msra.mxu1 %v3160_v63 }
  0x1b   :  { %2460 = vmatprep.subr.bf16.mxu1 %v2944_v3 }
  0x1d   :  { %2440 = vmatpush1.bf16.msra.mxu0 %v3148_v59 }
  0x1e   :  { %2442 = vmatprep.subr.bf16.mxu0 %v3151_v60  ;;  %2462 = vmatpush3.bf16.msra.mxu1 %v3174_v6 }
  0x1f   :  { %2463 = vmatprep.subr.bf16.mxu1 %v2944_v3 }
  0x21   :  { %2444 = vmatpush1.bf16.msra.mxu0 %v3170_v2 }
  0x22   :  { %2470 = vmatprep.subr.bf16.mxu0 %v2983_v5  ;;  %2465 = vmatpush3.bf16.msra.mxu1 %v3190_v12 }
  0x23   :  { %2466 = vmatprep.subr.bf16.mxu1 %v2944_v3 }
  0x24   :  { %155 = vmatmul.mubr.f32.vlgmr.msra.gmra.mrb[0].mxu0 %v3187_v11 }
  0x25   :  { %2472 = vmatpush1.bf16.msra.mxu0 %v2996_v9  ;;  %393 = vmatprep.mubr.f32.mxu0 %v2945_v4 }
  0x26   :  { %2474 = vmatprep.subr.bf16.mxu0 %v2998_v10  ;;  %2468 = vmatpush3.bf16.msra.mxu1 %v3204_v17 }
  0x27   :  { %2501 = vmatprep.subr.bf16.mxu1 %v2944_v3 }
  0x29   :  { %2476 = vmatpush1.bf16.msra.mxu0 %v3014_v15  ;;  %2166 = vmatmul.mubr.f32.vlgmr.msra.gmra.mrb[0].mxu1 %v3187_v11 }
  0x2a   :  { %2478 = vmatprep.subr.bf16.mxu0 %v3017_v16  ;;  %2503 = vmatpush3.bf16.msra.mxu1 %v3055_v29 }
  0x2b   :  { %2504 = vmatprep.subr.bf16.mxu1 %v2944_v3  ;;  %2200 = vmatprep.mubr.msk.f32.mxu1 %vm2946_vm0, %v2945_v4 }
  0x2d   :  { %2480 = vmatpush1.bf16.msra.mxu0 %v3032_v21 }
  0x2e   :  { %2482 = vmatprep.subr.bf16.mxu0 %v3035_v22  ;;  %2506 = vmatpush3.bf16.msra.mxu1 %v3079_v37 }
  0x2f   :  { %2507 = vmatprep.subr.bf16.mxu1 %v2944_v3 }
  0x31   :  { %2484 = vmatpush1.bf16.msra.mxu0 %v3061_v31 }
  0x32   :  { %2486 = vmatprep.subr.bf16.mxu0 %v3067_v33  ;;  %2509 = vmatpush3.bf16.msra.mxu1 %v3107_v46 }
  0x33   :  { %2510 = vmatprep.subr.bf16.mxu1 %v2944_v3 }
  0x35   :  { %2488 = vmatpush1.bf16.msra.mxu0 %v3092_v41 }
  0x36   :  { %2490 = vmatprep.subr.bf16.mxu0 %v3095_v42  ;;  %2512 = vmatpush3.bf16.msra.mxu1 %v3135_v55 }
  0x37   :  { %2513 = vmatprep.subr.bf16.mxu1 %v2944_v3 }
  0x39   :  { %2492 = vmatpush1.bf16.msra.mxu0 %v3120_v50 }
  0x3a   :  { %2494 = vmatprep.subr.bf16.mxu0 %v3123_v51  ;;  %2515 = vmatpush3.bf16.msra.mxu1 %v3160_v63 }
  0x3b   :  { %2516 = vmatprep.subr.bf16.mxu1 %v2944_v3 }
  0x3d   :  { %2496 = vmatpush1.bf16.msra.mxu0 %v3148_v59 }
  0x3e   :  { %2498 = vmatprep.subr.bf16.mxu0 %v3151_v60  ;;  %2518 = vmatpush3.bf16.msra.mxu1 %v3174_v6 }
  0x3f   :  { %2519 = vmatprep.subr.bf16.mxu1 %v2944_v3 }
  0x41   :  { %2500 = vmatpush1.bf16.msra.mxu0 %v3170_v2 }
  0x42   :  { %2526 = vmatprep.subr.bf16.mxu0 %v2983_v5  ;;  %2521 = vmatpush3.bf16.msra.mxu1 %v3190_v12 }
  0x43   :  { %2522 = vmatprep.subr.bf16.mxu1 %v2944_v3 }
  0x46   :  { %2524 = vmatpush3.bf16.msra.mxu1 %v3204_v17 }
  0x47   :  { %2557 = vmatprep.subr.bf16.mxu1 %v2944_v3 }
  0xf7   :  { %v156_v27 = vpop.f32.mrb[0].mxu0 }
  0xf8   :  { %v157_v30 = vadd.f32 %v156_v27, %v78_v25  ;;  %v158_v32 = vpop.f32.mrb[1].mxu0 }
  0xf9   :  { %v159_v34 = vadd.f32 %v158_v32, %v82_v26  ;;  %v1956_v32 = vld [vmem:[%s3833_s0 + $0x20] sm:$0xff] }
  0xfa   :  { %v234_v35 = vadd.f32 %v231_v28, %v157_v30 }
  0xfb   :  { %v241_v39 = vadd.f32 %v232_v36, %v159_v34 }
  0xfc   :  { %v1953_v38 = vmul.f32 -1.442695, %v234_v35  ;;  %v227_v40 = vpop.f32.mrb[0].mxu1 }
  0xfd   :  { %v1954_v43 = vmul.f32 -1.442695, %v241_v39  ;;  %v2167_v44 = vpop.f32.mrb[1].mxu1  ;;  %v228_v54 = vadd.f32 %v227_v40, %v86_v49  ;;  %v1957_v49 = vld [vmem:[%s3833_s0 + $0x28] sm:$0xff] }
  0xfe   :  { %2864 = vpow2.f32 %v1953_v38 }
  0xff   :  { %2866 = vpow2.f32 %v1954_v43 }
 0x108   :  { %v2865_v45 = vpop.eup %2864 }
 0x109   :  { %v238_v47 = vadd.f32 1.0, %v2865_v45  ;;  %v2867_v52 = vpop.eup %2866 }
 0x10a   :  { %v245_v53 = vadd.f32 1.0, %v2867_v52 }
 0x10b   :  { %2868 = vrcp.f32 %v238_v47 }
 0x10c   :  { %2870 = vrcp.f32 %v245_v53 }
 0x115   :  { %v2869_v56 = vpop.eup %2868 }
 0x116   :  { %v248_v58 = vmul.f32 %v2869_v56, %v228_v54  ;;  %v2871_v62 = vpop.eup %2870 }
 0x117   :  { %v251_v0 = vsub.f32 1.0, %v2871_v62  ;;  %v253_v8 = vmul.f32 %v2871_v62, %v3187_v11  ;;  %v312_v11 = vld [vmem:[%s3832_s3] sm:$0x7] }
 0x118   :  { %v249_v61 = vadd.f32 %v248_v58, %v233_v57  ;;  %v317_v14 = vrot.slane %v312_v11, %v3243_v20  ;;  %v321_v18 = vrot.slane %v312_v11, %v3248_v24  ;;  %v325_v43 = vrot.slane %v312_v11, %v3258_v48 }
 0x11a   :  { %2872 = vtanh.f32 %v249_v61 }
 0x124   :  { %v2873_v1 = vpop.eup %2872 }
 0x125   :  { %v252_v7 = vmul.f32 %v2873_v1, %v251_v0 }
 0x127   :  { %v3265_v13 = vadd.f32 %v253_v8, %v252_v7 }
 0x129   :  { %261 = vst [vmem:[%s3834_s4] sm:$0xff] %v3265_v13  ;;  %394 = vmatmul.mubr.f32.vlgmr.msra.gmra.mrb[2].mxu0 %v3265_v13  ;;  %2201 = vmatmul.mubr.f32.vlgmr.msra.gmra.mrb[2].mxu1 %v3265_v13 }
 0x12a   :  { %2528 = vmatpush1.bf16.msra.mxu0 %v2996_v9  ;;  %2559 = vmatpush3.bf16.msra.mxu1 %v3055_v29 }
 0x12b   :  { %2530 = vmatprep.subr.bf16.mxu0 %v2998_v10  ;;  %2560 = vmatprep.subr.bf16.mxu1 %v2944_v3 }
 0x12c   :  { %634 = vmatprep.mubr.f32.mxu0 %v2945_v4  ;;  %2235 = vmatprep.mubr.msk.f32.mxu1 %vm2946_vm0, %v2945_v4 }
 0x12e   :  { %2532 = vmatpush1.bf16.msra.mxu0 %v3014_v15  ;;  %2562 = vmatpush3.bf16.msra.mxu1 %v3079_v37 }
 0x12f   :  { %2534 = vmatprep.subr.bf16.mxu0 %v3017_v16  ;;  %2563 = vmatprep.subr.bf16.mxu1 %v2944_v3 }
 0x132   :  { %2536 = vmatpush1.bf16.msra.mxu0 %v3032_v21  ;;  %2565 = vmatpush3.bf16.msra.mxu1 %v3107_v46 }
 0x133   :  { %2538 = vmatprep.subr.bf16.mxu0 %v3035_v22  ;;  %2566 = vmatprep.subr.bf16.mxu1 %v2944_v3 }
 0x136   :  { %2540 = vmatpush1.bf16.msra.mxu0 %v3061_v31  ;;  %2568 = vmatpush3.bf16.msra.mxu1 %v3135_v55 }
 0x137   :  { %2542 = vmatprep.subr.bf16.mxu0 %v3067_v33  ;;  %2569 = vmatprep.subr.bf16.mxu1 %v2944_v3 }
 0x13a   :  { %2544 = vmatpush1.bf16.msra.mxu0 %v3092_v41  ;;  %2571 = vmatpush3.bf16.msra.mxu1 %v3160_v63 }
 0x13b   :  { %2546 = vmatprep.subr.bf16.mxu0 %v3095_v42  ;;  %2572 = vmatprep.subr.bf16.mxu1 %v2944_v3 }
 0x13e   :  { %2548 = vmatpush1.bf16.msra.mxu0 %v3120_v50  ;;  %2574 = vmatpush3.bf16.msra.mxu1 %v3174_v6 }
 0x13f   :  { %2550 = vmatprep.subr.bf16.mxu0 %v3123_v51  ;;  %2575 = vmatprep.subr.bf16.mxu1 %v2944_v3 }
 0x142   :  { %2552 = vmatpush1.bf16.msra.mxu0 %v3148_v59  ;;  %2577 = vmatpush3.bf16.msra.mxu1 %v3190_v12 }
 0x143   :  { %2554 = vmatprep.subr.bf16.mxu0 %v3151_v60  ;;  %2578 = vmatprep.subr.bf16.mxu1 %v2944_v3 }
 0x146   :  { %2556 = vmatpush1.bf16.msra.mxu0 %v3170_v2  ;;  %2580 = vmatpush3.bf16.msra.mxu1 %v3204_v17 }
 0x147   :  { %2582 = vmatprep.subr.bf16.mxu0 %v2983_v5  ;;  %2613 = vmatprep.subr.bf16.mxu1 %v2944_v3 }
 0x1fc   :  { %v395_v19 = vpop.f32.mrb[2].mxu0  ;;  %v466_v25 = vpop.f32.mrb[2].mxu1 }
 0x1fd   :  { %v396_v26 = vadd.f32 %v395_v19, %v317_v14  ;;  %v397_v27 = vpop.f32.mrb[3].mxu0  ;;  %v2202_v28 = vpop.f32.mrb[3].mxu1  ;;  %v467_v45 = vadd.f32 %v466_v25, %v325_v43  ;;  %v988_v19 = vld [vmem:[%s3830_s2 + $0x8] sm:$0xff]  ;;  %v995_v43 = vld [vmem:[%s3830_s2 + $0x40] sm:$0xff] }
 0x1fe   :  { %v398_v5 = vadd.f32 %v397_v27, %v321_v18  ;;  %v990_v27 = vld [vmem:[%s3830_s2 + $0x18] sm:$0xff]  ;;  %v989_v28 = vld [vmem:[%s3830_s2 + $0x10] sm:$0xff] }
 0x1ff   :  { %v474_v30 = vadd.f32 %v1955_v23, %v396_v26  ;;  %v991_v23 = vld [vmem:[%s3830_s2 + $0x20] sm:$0xff] }
 0x200   :  { %v481_v35 = vadd.f32 %v1956_v32, %v398_v5  ;;  %v3399_v25 = vpack.c.bf16 %v991_v23, %v988_v19  ;;  %v987_v26 = vld [vmem:[%s3830_s2] sm:$0xff]  ;;  %v1026_v19 = vld [vmem:[%s3830_s2 + $0x138] sm:$0xff]  ;;  %v1025_v23 = vld [vmem:[%s3830_s2 + $0x130] sm:$0xff] }
 0x201   :  { %v1958_v34 = vmul.f32 -1.442695, %v474_v30  ;;  %v3410_v5 = vpack.c.bf16 %v990_v27, %v987_v26  ;;  %v992_v30 = vld [vmem:[%s3830_s2 + $0x28] sm:$0xff] }
 0x202   :  { %v1959_v36 = vmul.f32 -1.442695, %v481_v35  ;;  %v3416_v32 = vpack.c.bf16 %v992_v30, %v989_v28  ;;  %v997_v35 = vld [vmem:[%s3830_s2 + $0x50] sm:$0xff]  ;;  %v1028_v26 = vld [vmem:[%s3830_s2 + $0x148] sm:$0xff]  ;;  %v1030_v28 = vld [vmem:[%s3830_s2 + $0x158] sm:$0xff] }
 0x203   :  { %2874 = vpow2.f32 %v1958_v34  ;;  %v994_v34 = vld [vmem:[%s3830_s2 + $0x38] sm:$0xff]  ;;  %v1033_v30 = vld [vmem:[%s3830_s2 + $0x170] sm:$0xff] }
 0x204   :  { %2876 = vpow2.f32 %v1959_v36  ;;  %v3426_v36 = vpack.c.bf16 %v997_v35, %v994_v34  ;;  %v3589_v34 = vpack.c.bf16 %v1028_v26, %v1025_v23  ;;  %v3591_v35 = vpack.c.bf16 %v1033_v30, %v1030_v28 }
 0x20d   :  { %v2875_v38 = vpop.eup %2874 }
 0x20e   :  { %v478_v39 = vadd.f32 1.0, %v2875_v38  ;;  %v2877_v40 = vpop.eup %2876  ;;  %v993_v38 = vld [vmem:[%s3830_s2 + $0x30] sm:$0xff] }
 0x20f   :  { %v485_v44 = vadd.f32 1.0, %v2877_v40 }
 0x210   :  { %2878 = vrcp.f32 %v478_v39  ;;  %v996_v39 = vld [vmem:[%s3830_s2 + $0x48] sm:$0xff] }
 0x211   :  { %2880 = vrcp.f32 %v485_v44  ;;  %v3435_v40 = vpack.c.bf16 %v996_v39, %v993_v38  ;;  %v998_v44 = vld [vmem:[%s3830_s2 + $0x58] sm:$0xff]  ;;  %v1029_v38 = vld [vmem:[%s3830_s2 + $0x150] sm:$0xff]  ;;  %v1032_v39 = vld [vmem:[%s3830_s2 + $0x168] sm:$0xff] }
 0x21a   :  { %v2879_v47 = vpop.eup %2878 }
 0x21b   :  { %v488_v52 = vmul.f32 %v2879_v47, %v467_v45  ;;  %v2881_v54 = vpop.eup %2880  ;;  %v3444_v45 = vpack.c.bf16 %v998_v44, %v995_v43  ;;  %v1000_v47 = vld [vmem:[%s3830_s2 + $0x68] sm:$0xff]  ;;  %v1031_v43 = vld [vmem:[%s3830_s2 + $0x160] sm:$0xff]  ;;  %v1034_v44 = vld [vmem:[%s3830_s2 + $0x178] sm:$0xff] }
 0x21c   :  { %v491_v56 = vsub.f32 1.0, %v2881_v54  ;;  %v493_v61 = vmul.f32 %v2881_v54, %v3265_v13  ;;  %v1002_v54 = vld [vmem:[%s3830_s2 + $0x78] sm:$0xff] }
 0x21d   :  { %v489_v53 = vadd.f32 %v1957_v49, %v488_v52  ;;  %v1003_v49 = vld [vmem:[%s3830_s2 + $0x80] sm:$0xff] }
 0x21e   :  { %v3454_v52 = vpack.c.bf16 %v1003_v49, %v1000_v47  ;;  %v3607_v47 = vpack.c.bf16 %v1032_v39, %v1029_v38  ;;  %v3611_v49 = vpack.c.bf16 %v1034_v44, %v1031_v43 }
 0x21f   :  { %2882 = vtanh.f32 %v489_v53  ;;  %v999_v53 = vld [vmem:[%s3830_s2 + $0x60] sm:$0xff] }
 0x229   :  { %v2883_v57 = vpop.eup %2882 }
 0x22a   :  { %v492_v58 = vmul.f32 %v2883_v57, %v491_v56  ;;  %v1001_v56 = vld [vmem:[%s3830_s2 + $0x70] sm:$0xff]  ;;  %v3466_v57 = vpack.c.bf16 %v1002_v54, %v999_v53  ;;  %v794_v53 = vld [vmem:[%s3832_s3] sm:$0x7] }
 0x22b   :  { %v799_v54 = vrot.slane %v794_v53, %v3243_v20 }
 0x22c   :  { %v3324_v62 = vadd.f32 %v493_v61, %v492_v58  ;;  %v1004_v58 = vld [vmem:[%s3830_s2 + $0x88] sm:$0xff] }
 0x22d   :  { %v3472_v61 = vpack.c.bf16 %v1004_v58, %v1001_v56  ;;  %v803_v56 = vrot.slane %v794_v53, %v3248_v24 }
 0x22e   :  { %1960 = vst [vmem:[%s3834_s4 + $0x8] sm:$0xff] %v3324_v62  ;;  %635 = vmatmul.mubr.f32.vlgmr.msra.gmra.mrb[4].mxu0 %v3324_v62  ;;  %2236 = vmatmul.mubr.f32.vlgmr.msra.gmra.mrb[4].mxu1 %v3324_v62 }
 0x22f   :  { %2584 = vmatpush1.bf16.msra.mxu0 %v2996_v9  ;;  %2615 = vmatpush3.bf16.msra.mxu1 %v3055_v29  ;;  %v553_v9 = vld [vmem:[%s3832_s3] sm:$0x7] }
 0x230   :  { %2586 = vmatprep.subr.bf16.mxu0 %v2998_v10  ;;  %2616 = vmatprep.subr.bf16.mxu1 %v2944_v3  ;;  %v558_v10 = vrot.slane %v553_v9, %v3243_v20 }
 0x231   :  { %875 = vmatprep.mubr.f32.mxu0 %v2945_v4  ;;  %2270 = vmatprep.mubr.msk.f32.mxu1 %vm2946_vm0, %v2945_v4 }
 0x233   :  { %2588 = vmatpush1.bf16.msra.mxu0 %v3014_v15  ;;  %2618 = vmatpush3.bf16.msra.mxu1 %v3079_v37  ;;  %v562_v15 = vrot.slane %v553_v9, %v3248_v24 }
 0x234   :  { %2590 = vmatprep.subr.bf16.mxu0 %v3017_v16  ;;  %2619 = vmatprep.subr.bf16.mxu1 %v2944_v3 }
 0x237   :  { %2592 = vmatpush1.bf16.msra.mxu0 %v3032_v21  ;;  %2621 = vmatpush3.bf16.msra.mxu1 %v3107_v46  ;;  %v1961_v21 = vld [vmem:[%s3833_s0 + $0x30] sm:$0xff] }
 0x238   :  { %2594 = vmatprep.subr.bf16.mxu0 %v3035_v22  ;;  %2622 = vmatprep.subr.bf16.mxu1 %v2944_v3 }
 0x23b   :  { %2596 = vmatpush1.bf16.msra.mxu0 %v3061_v31  ;;  %2624 = vmatpush3.bf16.msra.mxu1 %v3135_v55 }
 0x23c   :  { %2598 = vmatprep.subr.bf16.mxu0 %v3067_v33  ;;  %2625 = vmatprep.subr.bf16.mxu1 %v2944_v3 }
 0x23f   :  { %2600 = vmatpush1.bf16.msra.mxu0 %v3092_v41  ;;  %2627 = vmatpush3.bf16.msra.mxu1 %v3160_v63  ;;  %v566_v63 = vrot.slane %v553_v9, %v3258_v48  ;;  %v1009_v9 = vld [vmem:[%s3830_s2 + $0xb0] sm:$0xff] }
 0x240   :  { %2602 = vmatprep.subr.bf16.mxu0 %v3095_v42  ;;  %2628 = vmatprep.subr.bf16.mxu1 %v2944_v3  ;;  %v1962_v42 = vld [vmem:[%s3833_s0 + $0x38] sm:$0xff] }
 0x243   :  { %2604 = vmatpush1.bf16.msra.mxu0 %v3120_v50  ;;  %2630 = vmatpush3.bf16.msra.mxu1 %v3174_v6 }
 0x244   :  { %2606 = vmatprep.subr.bf16.mxu0 %v3123_v51  ;;  %2631 = vmatprep.subr.bf16.mxu1 %v2944_v3 }
 0x247   :  { %2608 = vmatpush1.bf16.msra.mxu0 %v3148_v59  ;;  %2633 = vmatpush3.bf16.msra.mxu1 %v3190_v12 }
 0x248   :  { %2610 = vmatprep.subr.bf16.mxu0 %v3151_v60  ;;  %2634 = vmatprep.subr.bf16.mxu1 %v2944_v3 }
 0x24b   :  { %2612 = vmatpush1.bf16.msra.mxu0 %v3170_v2  ;;  %2636 = vmatpush3.bf16.msra.mxu1 %v3204_v17  ;;  %v1963_v17 = vld [vmem:[%s3833_s0 + $0x40] sm:$0xff] }
 0x24c   :  { %2669 = vmatprep.subr.bf16.mxu1 %v2944_v3  ;;  %2638 = vmatprep.subr.bf16.mxu0 %v3399_v25 }
 0x301   :  { %v636_v16 = vpop.f32.mrb[4].mxu0  ;;  %v707_v22 = vpop.f32.mrb[4].mxu1 }
 0x302   :  { %v637_v29 = vadd.f32 %v636_v16, %v558_v10  ;;  %v638_v31 = vpop.f32.mrb[5].mxu0  ;;  %v2237_v33 = vpop.f32.mrb[5].mxu1  ;;  %v708_v6 = vadd.f32 %v707_v22, %v566_v63  ;;  %v1008_v16 = vld [vmem:[%s3830_s2 + $0xa8] sm:$0xff]  ;;  %v1021_v63 = vld [vmem:[%s3830_s2 + $0x110] sm:$0xff] }
 0x303   :  { %v639_v37 = vadd.f32 %v638_v31, %v562_v15  ;;  %v1005_v15 = vld [vmem:[%s3830_s2 + $0x90] sm:$0xff]  ;;  %v1012_v33 = vld [vmem:[%s3830_s2 + $0xc8] sm:$0xff] }
 0x304   :  { %v715_v41 = vadd.f32 %v1961_v21, %v637_v29  ;;  %v1007_v21 = vld [vmem:[%s3830_s2 + $0xa0] sm:$0xff]  ;;  %v3494_v22 = vpack.c.bf16 %v1008_v16, %v1005_v15  ;;  %v1010_v29 = vld [vmem:[%s3830_s2 + $0xb8] sm:$0xff] }
 0x305   :  { %v722_v50 = vadd.f32 %v1962_v42, %v639_v37  ;;  %v3500_v31 = vpack.c.bf16 %v1010_v29, %v1007_v21  ;;  %v1015_v37 = vld [vmem:[%s3830_s2 + $0xe0] sm:$0xff] }
 0x306   :  { %v1964_v46 = vmul.f32 -1.442695, %v715_v41  ;;  %v3510_v41 = vpack.c.bf16 %v1015_v37, %v1012_v33  ;;  %v1011_v42 = vld [vmem:[%s3830_s2 + $0xc0] sm:$0xff]  ;;  %v1968_v37 = vld [vmem:[%s3833_s0 + $0x50] sm:$0xff] }
 0x307   :  { %v1965_v51 = vmul.f32 -1.442695, %v722_v50  ;;  %v1013_v50 = vld [vmem:[%s3830_s2 + $0xd0] sm:$0xff] }
 0x308   :  { %2884 = vpow2.f32 %v1964_v46  ;;  %v1014_v46 = vld [vmem:[%s3830_s2 + $0xd8] sm:$0xff] }
 0x309   :  { %2886 = vpow2.f32 %v1965_v51  ;;  %v3522_v51 = vpack.c.bf16 %v1014_v46, %v1011_v42 }
 0x312   :  { %v2885_v55 = vpop.eup %2884 }
 0x313   :  { %v719_v59 = vadd.f32 1.0, %v2885_v55  ;;  %v2887_v60 = vpop.eup %2886  ;;  %v1016_v55 = vld [vmem:[%s3830_s2 + $0xe8] sm:$0xff] }
 0x314   :  { %v726_v2 = vadd.f32 1.0, %v2887_v60  ;;  %v1018_v60 = vld [vmem:[%s3830_s2 + $0xf8] sm:$0xff] }
 0x315   :  { %2888 = vrcp.f32 %v719_v59  ;;  %v3528_v59 = vpack.c.bf16 %v1016_v55, %v1013_v50 }
 0x316   :  { %2890 = vrcp.f32 %v726_v2  ;;  %v1017_v2 = vld [vmem:[%s3830_s2 + $0xf0] sm:$0xff] }
 0x31f   :  { %v2889_v12 = vpop.eup %2888 }
 0x320   :  { %v729_v0 = vmul.f32 %v2889_v12, %v708_v6  ;;  %v2891_v7 = vpop.eup %2890  ;;  %v3541_v6 = vpack.c.bf16 %v1021_v63, %v1018_v60  ;;  %v1020_v12 = vld [vmem:[%s3830_s2 + $0x108] sm:$0xff] }
 0x321   :  { %v732_v8 = vsub.f32 1.0, %v2891_v7  ;;  %v734_v14 = vmul.f32 %v2891_v7, %v3324_v62  ;;  %v1006_v62 = vld [vmem:[%s3830_s2 + $0x98] sm:$0xff] }
 0x322   :  { %v730_v1 = vadd.f32 %v1963_v17, %v729_v0  ;;  %v3482_v10 = vpack.c.bf16 %v1009_v9, %v1006_v62  ;;  %v1019_v17 = vld [vmem:[%s3830_s2 + $0x100] sm:$0xff]  ;;  %v1022_v0 = vld [vmem:[%s3830_s2 + $0x118] sm:$0xff]  ;;  %v1967_v62 = vld [vmem:[%s3833_s0 + $0x48] sm:$0xff] }
 0x323   :  { %v3555_v7 = vpack.c.bf16 %v1022_v0, %v1019_v17 }
 0x324   :  { %2892 = vtanh.f32 %v730_v1  ;;  %v3553_v1 = vpack.c.bf16 %v1020_v12, %v1017_v2  ;;  %v807_v2 = vrot.slane %v794_v53, %v3258_v48  ;;  %v1973_v53 = vld [vmem:[%s3833_s0 + $0x60] sm:$0xff] }
 0x32e   :  { %v2893_v13 = vpop.eup %2892 }
 0x32f   :  { %v733_v11 = vmul.f32 %v2893_v13, %v732_v8  ;;  %v1024_v8 = vld [vmem:[%s3830_s2 + $0x128] sm:$0xff]  ;;  %v1027_v13 = vld [vmem:[%s3830_s2 + $0x140] sm:$0xff] }
 0x331   :  { %v3382_v18 = vadd.f32 %v734_v14, %v733_v11  ;;  %v1023_v11 = vld [vmem:[%s3830_s2 + $0x120] sm:$0xff]  ;;  %v3567_v14 = vpack.c.bf16 %v1027_v13, %v1024_v8  ;;  %v1969_v8 = vld [vmem:[%s3833_s0 + $0x58] sm:$0xff] }
 0x332   :  { %v3579_v27 = vpack.c.bf16 %v1026_v19, %v1023_v11 }
 0x333   :  { %1966 = vst [vmem:[%s3834_s4 + $0x10] sm:$0xff] %v3382_v18  ;;  %876 = vmatmul.mubr.f32.vlgmr.msra.gmra.mrb[6].mxu0 %v3382_v18  ;;  %2271 = vmatmul.mubr.f32.vlgmr.msra.gmra.mrb[6].mxu1 %v3382_v18 }
 0x334   :  { %1116 = vmatprep.mubr.f32.mxu0 %v2945_v4  ;;  %2305 = vmatprep.mubr.msk.f32.mxu1 %vm2946_vm0, %v2945_v4 }
 0x335   :  { %2640 = vmatpush1.bf16.msra.mxu0 %v3410_v5  ;;  %2671 = vmatpush3.bf16.msra.mxu1 %v3416_v32 }
 0x336   :  { %2672 = vmatprep.subr.bf16.mxu1 %v2944_v3  ;;  %2642 = vmatprep.subr.bf16.mxu0 %v3426_v36 }
 0x339   :  { %2644 = vmatpush1.bf16.msra.mxu0 %v3435_v40  ;;  %2674 = vmatpush3.bf16.msra.mxu1 %v3444_v45 }
 0x33a   :  { %2675 = vmatprep.subr.bf16.mxu1 %v2944_v3  ;;  %2646 = vmatprep.subr.bf16.mxu0 %v3454_v52 }
 0x33d   :  { %2648 = vmatpush1.bf16.msra.mxu0 %v3466_v57  ;;  %2677 = vmatpush3.bf16.msra.mxu1 %v3472_v61 }
 0x33e   :  { %2678 = vmatprep.subr.bf16.mxu1 %v2944_v3  ;;  %2650 = vmatprep.subr.bf16.mxu0 %v3482_v10 }
 0x341   :  { %2652 = vmatpush1.bf16.msra.mxu0 %v3494_v22  ;;  %2680 = vmatpush3.bf16.msra.mxu1 %v3500_v31 }
 0x342   :  { %2681 = vmatprep.subr.bf16.mxu1 %v2944_v3  ;;  %2654 = vmatprep.subr.bf16.mxu0 %v3510_v41 }
 0x345   :  { %2656 = vmatpush1.bf16.msra.mxu0 %v3522_v51  ;;  %2683 = vmatpush3.bf16.msra.mxu1 %v3528_v59 }
 0x346   :  { %2684 = vmatprep.subr.bf16.mxu1 %v2944_v3  ;;  %2658 = vmatprep.subr.bf16.mxu0 %v3541_v6 }
 0x349   :  { %2660 = vmatpush1.bf16.msra.mxu0 %v3553_v1  ;;  %2686 = vmatpush3.bf16.msra.mxu1 %v3555_v7 }
 0x34a   :  { %2662 = vmatprep.subr.bf16.mxu0 %v3567_v14  ;;  %2687 = vmatprep.subr.bf16.mxu1 %v2944_v3 }
 0x34d   :  { %2664 = vmatpush1.bf16.msra.mxu0 %v3579_v27  ;;  %2689 = vmatpush3.bf16.msra.mxu1 %v3589_v34 }
 0x34e   :  { %2666 = vmatprep.subr.bf16.mxu0 %v3591_v35  ;;  %2690 = vmatprep.subr.bf16.mxu1 %v2944_v3 }
 0x351   :  { %2668 = vmatpush1.bf16.msra.mxu0 %v3607_v47  ;;  %2692 = vmatpush3.bf16.msra.mxu1 %v3611_v49 }
 0x352   :  { %2694 = vmatprep.subr.bf16.mxu0 %v3399_v25  ;;  %2725 = vmatprep.subr.bf16.mxu1 %v2944_v3 }
 0x406   :  { %v877_v58 = vpop.f32.mrb[6].mxu0  ;;  %v948_v9 = vpop.f32.mrb[6].mxu1 }
 0x407   :  { %v878_v15 = vadd.f32 %v877_v58, %v799_v54  ;;  %v879_v16 = vpop.f32.mrb[7].mxu0  ;;  %v2272_v21 = vpop.f32.mrb[7].mxu1  ;;  %v949_v17 = vadd.f32 %v948_v9, %v807_v2  ;;  %v1975_v2 = vld [vmem:[%s3833_s0 + $0x70] sm:$0xff] }
 0x408   :  { %v880_v29 = vadd.f32 %v879_v16, %v803_v56  ;;  %v1974_v16 = vld [vmem:[%s3833_s0 + $0x68] sm:$0xff] }
 0x409   :  { %v956_v33 = vadd.f32 %v1967_v62, %v878_v15 }
 0x40a   :  { %v963_v46 = vadd.f32 %v1968_v37, %v880_v29 }
 0x40b   :  { %v1970_v42 = vmul.f32 -1.442695, %v956_v33 }
 0x40c   :  { %v1971_v50 = vmul.f32 -1.442695, %v963_v46 }
 0x40d   :  { %2894 = vpow2.f32 %v1970_v42 }
 0x40e   :  { %2896 = vpow2.f32 %v1971_v50 }
 0x417   :  { %v2895_v55 = vpop.eup %2894 }
 0x418   :  { %v960_v60 = vadd.f32 1.0, %v2895_v55  ;;  %v2897_v63 = vpop.eup %2896 }
 0x419   :  { %v967_v12 = vadd.f32 1.0, %v2897_v63 }
 0x41a   :  { %2898 = vrcp.f32 %v960_v60 }
 0x41b   :  { %2900 = vrcp.f32 %v967_v12 }
 0x424   :  { %v2899_v0 = vpop.eup %2898 }
 0x425   :  { %v970_v13 = vmul.f32 %v2899_v0, %v949_v17  ;;  %v2901_v19 = vpop.eup %2900 }
 0x426   :  { %v973_v23 = vsub.f32 1.0, %v2901_v19  ;;  %v975_v30 = vmul.f32 %v2901_v19, %v3382_v18  ;;  %v1035_v18 = vld [vmem:[%s3832_s3] sm:$0x7] }
 0x427   :  { %v971_v11 = vadd.f32 %v1969_v8, %v970_v13  ;;  %v1040_v39 = vrot.slane %v1035_v18, %v3243_v20  ;;  %v1044_v43 = vrot.slane %v1035_v18, %v3248_v24  ;;  %v1048_v50 = vrot.slane %v1035_v18, %v3258_v48  ;;  %v1979_v18 = vld [vmem:[%s3833_s0 + $0x78] sm:$0xff] }
 0x429   :  { %2902 = vtanh.f32 %v971_v11 }
 0x433   :  { %v2903_v26 = vpop.eup %2902 }
 0x434   :  { %v974_v28 = vmul.f32 %v2903_v26, %v973_v23  ;;  %v1276_v26 = vld [vmem:[%s3832_s3] sm:$0x7] }
 0x436   :  { %v3634_v38 = vadd.f32 %v975_v30, %v974_v28  ;;  %v1281_v28 = vrot.slane %v1276_v26, %v3243_v20  ;;  %v1285_v30 = vrot.slane %v1276_v26, %v3248_v24 }
 0x438   :  { %1972 = vst [vmem:[%s3834_s4 + $0x18] sm:$0xff] %v3634_v38  ;;  %1117 = vmatmul.mubr.f32.vlgmr.msra.gmra.mrb[8].mxu0 %v3634_v38  ;;  %2306 = vmatmul.mubr.f32.vlgmr.msra.gmra.mrb[8].mxu1 %v3634_v38 }
 0x439   :  { %2696 = vmatpush1.bf16.msra.mxu0 %v3410_v5  ;;  %2727 = vmatpush3.bf16.msra.mxu1 %v3416_v32 }
 0x43a   :  { %2698 = vmatprep.subr.bf16.mxu0 %v3426_v36  ;;  %2728 = vmatprep.subr.bf16.mxu1 %v2944_v3 }
 0x43b   :  { %1357 = vmatprep.mubr.f32.mxu0 %v2945_v4  ;;  %2340 = vmatprep.mubr.msk.f32.mxu1 %vm2946_vm0, %v2945_v4 }
 0x43d   :  { %2700 = vmatpush1.bf16.msra.mxu0 %v3435_v40  ;;  %2730 = vmatpush3.bf16.msra.mxu1 %v3444_v45 }
 0x43e   :  { %2702 = vmatprep.subr.bf16.mxu0 %v3454_v52  ;;  %2731 = vmatprep.subr.bf16.mxu1 %v2944_v3 }
 0x441   :  { %2704 = vmatpush1.bf16.msra.mxu0 %v3466_v57  ;;  %2733 = vmatpush3.bf16.msra.mxu1 %v3472_v61 }
 0x442   :  { %2706 = vmatprep.subr.bf16.mxu0 %v3482_v10  ;;  %2734 = vmatprep.subr.bf16.mxu1 %v2944_v3 }
 0x445   :  { %2708 = vmatpush1.bf16.msra.mxu0 %v3494_v22  ;;  %2736 = vmatpush3.bf16.msra.mxu1 %v3500_v31 }
 0x446   :  { %2710 = vmatprep.subr.bf16.mxu0 %v3510_v41  ;;  %2737 = vmatprep.subr.bf16.mxu1 %v2944_v3 }
 0x449   :  { %2712 = vmatpush1.bf16.msra.mxu0 %v3522_v51  ;;  %2739 = vmatpush3.bf16.msra.mxu1 %v3528_v59 }
 0x44a   :  { %2714 = vmatprep.subr.bf16.mxu0 %v3541_v6  ;;  %2740 = vmatprep.subr.bf16.mxu1 %v2944_v3 }
 0x44d   :  { %2716 = vmatpush1.bf16.msra.mxu0 %v3553_v1  ;;  %2742 = vmatpush3.bf16.msra.mxu1 %v3555_v7 }
 0x44e   :  { %2718 = vmatprep.subr.bf16.mxu0 %v3567_v14  ;;  %2743 = vmatprep.subr.bf16.mxu1 %v2944_v3 }
 0x451   :  { %2720 = vmatpush1.bf16.msra.mxu0 %v3579_v27  ;;  %2745 = vmatpush3.bf16.msra.mxu1 %v3589_v34 }
 0x452   :  { %2722 = vmatprep.subr.bf16.mxu0 %v3591_v35  ;;  %2746 = vmatprep.subr.bf16.mxu1 %v2944_v3 }
 0x455   :  { %2724 = vmatpush1.bf16.msra.mxu0 %v3607_v47  ;;  %2748 = vmatpush3.bf16.msra.mxu1 %v3611_v49 }
 0x456   :  { %2750 = vmatprep.subr.bf16.mxu0 %v3399_v25  ;;  %2781 = vmatprep.subr.bf16.mxu1 %v2944_v3 }
 0x50b   :  { %v1118_v44 = vpop.f32.mrb[8].mxu0  ;;  %v1189_v54 = vpop.f32.mrb[8].mxu1 }
 0x50c   :  { %v1119_v56 = vadd.f32 %v1118_v44, %v1040_v39  ;;  %v1120_v58 = vpop.f32.mrb[9].mxu0  ;;  %v2307_v62 = vpop.f32.mrb[9].mxu1  ;;  %v1190_v60 = vadd.f32 %v1189_v54, %v1048_v50 }
 0x50d   :  { %v1121_v9 = vadd.f32 %v1120_v58, %v1044_v43 }
 0x50e   :  { %v1197_v15 = vadd.f32 %v1973_v53, %v1119_v56  ;;  %v1980_v56 = vld [vmem:[%s3833_s0 + $0x80] sm:$0xff] }
 0x50f   :  { %v1204_v29 = vadd.f32 %v1974_v16, %v1121_v9 }
 0x510   :  { %v1976_v21 = vmul.f32 -1.442695, %v1197_v15 }
 0x511   :  { %v1977_v33 = vmul.f32 -1.442695, %v1204_v29  ;;  %v1289_v29 = vrot.slane %v1276_v26, %v3258_v48 }
 0x512   :  { %2904 = vpow2.f32 %v1976_v21 }
 0x513   :  { %2906 = vpow2.f32 %v1977_v33 }
 0x51c   :  { %v2905_v37 = vpop.eup %2904 }
 0x51d   :  { %v1201_v42 = vadd.f32 1.0, %v2905_v37  ;;  %v2907_v46 = vpop.eup %2906 }
 0x51e   :  { %v1208_v55 = vadd.f32 1.0, %v2907_v46  ;;  %v1981_v46 = vld [vmem:[%s3833_s0 + $0x88] sm:$0xff] }
 0x51f   :  { %2908 = vrcp.f32 %v1201_v42 }
 0x520   :  { %2910 = vrcp.f32 %v1208_v55 }
 0x529   :  { %v2909_v63 = vpop.eup %2908 }
 0x52a   :  { %v1211_v12 = vmul.f32 %v2909_v63, %v1190_v60  ;;  %v2911_v0 = vpop.eup %2910 }
 0x52b   :  { %v1214_v8 = vsub.f32 1.0, %v2911_v0  ;;  %v1216_v19 = vmul.f32 %v2911_v0, %v3634_v38 }
 0x52c   :  { %v1212_v17 = vadd.f32 %v1975_v2, %v1211_v12 }
 0x52e   :  { %2912 = vtanh.f32 %v1212_v17 }
 0x538   :  { %v2913_v13 = vpop.eup %2912 }
 0x539   :  { %v1215_v11 = vmul.f32 %v2913_v13, %v1214_v8 }
 0x53b   :  { %v3693_v23 = vadd.f32 %v1216_v19, %v1215_v11 }
 0x53d   :  { %1978 = vst [vmem:[%s3834_s4 + $0x20] sm:$0xff] %v3693_v23  ;;  %1358 = vmatmul.mubr.f32.vlgmr.msra.gmra.mrb[10].mxu0 %v3693_v23  ;;  %2341 = vmatmul.mubr.f32.vlgmr.msra.gmra.mrb[10].mxu1 %v3693_v23 }
 0x53e   :  { %2752 = vmatpush1.bf16.msra.mxu0 %v3410_v5  ;;  %2783 = vmatpush3.bf16.msra.mxu1 %v3416_v32 }
 0x53f   :  { %2754 = vmatprep.subr.bf16.mxu0 %v3426_v36  ;;  %2784 = vmatprep.subr.bf16.mxu1 %v2944_v3 }
 0x540   :  { %1598 = vmatprep.mubr.f32.mxu0 %v2945_v4  ;;  %2375 = vmatprep.mubr.msk.f32.mxu1 %vm2946_vm0, %v2945_v4 }
 0x542   :  { %2756 = vmatpush1.bf16.msra.mxu0 %v3435_v40  ;;  %2786 = vmatpush3.bf16.msra.mxu1 %v3444_v45 }
 0x543   :  { %2758 = vmatprep.subr.bf16.mxu0 %v3454_v52  ;;  %2787 = vmatprep.subr.bf16.mxu1 %v2944_v3 }
 0x546   :  { %2760 = vmatpush1.bf16.msra.mxu0 %v3466_v57  ;;  %2789 = vmatpush3.bf16.msra.mxu1 %v3472_v61 }
 0x547   :  { %2762 = vmatprep.subr.bf16.mxu0 %v3482_v10  ;;  %2790 = vmatprep.subr.bf16.mxu1 %v2944_v3 }
 0x54a   :  { %2764 = vmatpush1.bf16.msra.mxu0 %v3494_v22  ;;  %2792 = vmatpush3.bf16.msra.mxu1 %v3500_v31 }
 0x54b   :  { %2766 = vmatprep.subr.bf16.mxu0 %v3510_v41  ;;  %2793 = vmatprep.subr.bf16.mxu1 %v2944_v3 }
 0x54e   :  { %2768 = vmatpush1.bf16.msra.mxu0 %v3522_v51  ;;  %2795 = vmatpush3.bf16.msra.mxu1 %v3528_v59 }
 0x54f   :  { %2770 = vmatprep.subr.bf16.mxu0 %v3541_v6  ;;  %2796 = vmatprep.subr.bf16.mxu1 %v2944_v3 }
 0x552   :  { %2772 = vmatpush1.bf16.msra.mxu0 %v3553_v1  ;;  %2798 = vmatpush3.bf16.msra.mxu1 %v3555_v7 }
 0x553   :  { %2774 = vmatprep.subr.bf16.mxu0 %v3567_v14  ;;  %2799 = vmatprep.subr.bf16.mxu1 %v2944_v3 }
 0x556   :  { %2776 = vmatpush1.bf16.msra.mxu0 %v3579_v27  ;;  %2801 = vmatpush3.bf16.msra.mxu1 %v3589_v34 }
 0x557   :  { %2778 = vmatprep.subr.bf16.mxu0 %v3591_v35  ;;  %2802 = vmatprep.subr.bf16.mxu1 %v2944_v3 }
 0x55a   :  { %2780 = vmatpush1.bf16.msra.mxu0 %v3607_v47  ;;  %2804 = vmatpush3.bf16.msra.mxu1 %v3611_v49 }
 0x55b   :  { %2806 = vmatprep.subr.bf16.mxu0 %v3399_v25  ;;  %2837 = vmatprep.subr.bf16.mxu1 %v2944_v3 }
 0x610   :  { %v1359_v38 = vpop.f32.mrb[10].mxu0  ;;  %v1430_v39 = vpop.f32.mrb[10].mxu1 }
 0x611   :  { %v1360_v43 = vadd.f32 %v1359_v38, %v1281_v28  ;;  %v1361_v44 = vpop.f32.mrb[11].mxu0  ;;  %v2342_v53 = vpop.f32.mrb[11].mxu1  ;;  %v1431_v37 = vadd.f32 %v1430_v39, %v1289_v29  ;;  %v1758_v28 = vld [vmem:[%s3832_s3] sm:$0x7]  ;;  %v1991_v39 = vld [vmem:[%s3833_s0 + $0xa8] sm:$0xff] }
 0x612   :  { %v1362_v25 = vadd.f32 %v1361_v44, %v1285_v30  ;;  %v1763_v30 = vrot.slane %v1758_v28, %v3243_v20  ;;  %v1767_v38 = vrot.slane %v1758_v28, %v3248_v24 }
 0x613   :  { %v1438_v54 = vadd.f32 %v1979_v18, %v1360_v43 }
 0x614   :  { %v1445_v62 = vadd.f32 %v1980_v56, %v1362_v25 }
 0x615   :  { %v1982_v58 = vmul.f32 -1.442695, %v1438_v54 }
 0x616   :  { %v1983_v9 = vmul.f32 -1.442695, %v1445_v62 }
 0x617   :  { %2914 = vpow2.f32 %v1982_v58  ;;  %v1992_v58 = vld [vmem:[%s3833_s0 + $0xb0] sm:$0xff] }
 0x618   :  { %2916 = vpow2.f32 %v1983_v9 }
 0x621   :  { %v2915_v15 = vpop.eup %2914 }
 0x622   :  { %v1442_v16 = vadd.f32 1.0, %v2915_v15  ;;  %v2917_v21 = vpop.eup %2916 }
 0x623   :  { %v1449_v33 = vadd.f32 1.0, %v2917_v21  ;;  %v1771_v21 = vrot.slane %v1758_v28, %v3258_v48 }
 0x624   :  { %2918 = vrcp.f32 %v1442_v16 }
 0x625   :  { %2920 = vrcp.f32 %v1449_v33 }
 0x62e   :  { %v2919_v42 = vpop.eup %2918 }
 0x62f   :  { %v1452_v50 = vmul.f32 %v2919_v42, %v1431_v37  ;;  %v2921_v60 = vpop.eup %2920  ;;  %v1993_v42 = vld [vmem:[%s3833_s0 + $0xb8] sm:$0xff] }
 0x630   :  { %v1455_v63 = vsub.f32 1.0, %v2921_v60  ;;  %v1457_v17 = vmul.f32 %v2921_v60, %v3693_v23 }
 0x631   :  { %v1453_v55 = vadd.f32 %v1981_v46, %v1452_v50 }
 0x633   :  { %2922 = vtanh.f32 %v1453_v55 }
 0x63d   :  { %v2923_v2 = vpop.eup %2922 }
 0x63e   :  { %v1456_v12 = vmul.f32 %v2923_v2, %v1455_v63 }
 0x640   :  { %v3752_v0 = vadd.f32 %v1457_v17, %v1456_v12 }
 0x642   :  { %1984 = vst [vmem:[%s3834_s4 + $0x28] sm:$0xff] %v3752_v0  ;;  %1599 = vmatmul.mubr.f32.vlgmr.msra.gmra.mrb[12].mxu0 %v3752_v0  ;;  %2376 = vmatmul.mubr.f32.vlgmr.msra.gmra.mrb[12].mxu1 %v3752_v0 }
 0x643   :  { %2808 = vmatpush1.bf16.msra.mxu0 %v3410_v5  ;;  %2839 = vmatpush3.bf16.msra.mxu1 %v3416_v32 }
 0x644   :  { %2810 = vmatprep.subr.bf16.mxu0 %v3426_v36  ;;  %2840 = vmatprep.subr.bf16.mxu1 %v2944_v3 }
 0x645   :  { %1839 = vmatprep.mubr.f32.mxu0 %v2945_v4  ;;  %2410 = vmatprep.mubr.msk.f32.mxu1 %vm2946_vm0, %v2945_v4  ;;  %v1517_v4 = vld [vmem:[%s3832_s3] sm:$0x7] }
 0x646   :  { %v1522_v5 = vrot.slane %v1517_v4, %v3243_v20  ;;  %v1526_v32 = vrot.slane %v1517_v4, %v3248_v24 }
 0x647   :  { %2812 = vmatpush1.bf16.msra.mxu0 %v3435_v40  ;;  %2842 = vmatpush3.bf16.msra.mxu1 %v3444_v45  ;;  %v1985_v40 = vld [vmem:[%s3833_s0 + $0x90] sm:$0xff] }
 0x648   :  { %2814 = vmatprep.subr.bf16.mxu0 %v3454_v52  ;;  %2843 = vmatprep.subr.bf16.mxu1 %v2944_v3 }
 0x64b   :  { %2816 = vmatpush1.bf16.msra.mxu0 %v3466_v57  ;;  %2845 = vmatpush3.bf16.msra.mxu1 %v3472_v61 }
 0x64c   :  { %2818 = vmatprep.subr.bf16.mxu0 %v3482_v10  ;;  %2846 = vmatprep.subr.bf16.mxu1 %v2944_v3 }
 0x64f   :  { %2820 = vmatpush1.bf16.msra.mxu0 %v3494_v22  ;;  %2848 = vmatpush3.bf16.msra.mxu1 %v3500_v31  ;;  %v1986_v22 = vld [vmem:[%s3833_s0 + $0x98] sm:$0xff] }
 0x650   :  { %2822 = vmatprep.subr.bf16.mxu0 %v3510_v41  ;;  %2849 = vmatprep.subr.bf16.mxu1 %v2944_v3 }
 0x653   :  { %2824 = vmatpush1.bf16.msra.mxu0 %v3522_v51  ;;  %2851 = vmatpush3.bf16.msra.mxu1 %v3528_v59 }
 0x654   :  { %2826 = vmatprep.subr.bf16.mxu0 %v3541_v6  ;;  %2852 = vmatprep.subr.bf16.mxu1 %v2944_v3 }
 0x657   :  { %2828 = vmatpush1.bf16.msra.mxu0 %v3553_v1  ;;  %2854 = vmatpush3.bf16.msra.mxu1 %v3555_v7  ;;  %v1530_v7 = vrot.slane %v1517_v4, %v3258_v48 }
 0x658   :  { %2830 = vmatprep.subr.bf16.mxu0 %v3567_v14  ;;  %2855 = vmatprep.subr.bf16.mxu1 %v2944_v3 }
 0x65b   :  { %2832 = vmatpush1.bf16.msra.mxu0 %v3579_v27  ;;  %2857 = vmatpush3.bf16.msra.mxu1 %v3589_v34 }
 0x65c   :  { %2834 = vmatprep.subr.bf16.mxu0 %v3591_v35  ;;  %2858 = vmatprep.subr.bf16.mxu1 %v2944_v3  ;;  %v1987_v35 = vld [vmem:[%s3833_s0 + $0xa0] sm:$0xff] }
 0x65f   :  { %2836 = vmatpush1.bf16.msra.mxu0 %v3607_v47  ;;  %2860 = vmatpush3.bf16.msra.mxu1 %v3611_v49 }
 0x715   :  { %v1600_v36 = vpop.f32.mrb[12].mxu0  ;;  %v1671_v45 = vpop.f32.mrb[12].mxu1 }
 0x716   :  { %v1601_v52 = vadd.f32 %v1600_v36, %v1522_v5  ;;  %v1602_v3 = vpop.f32.mrb[13].mxu0  ;;  %v2377_v57 = vpop.f32.mrb[13].mxu1  ;;  %v1672_v27 = vadd.f32 %v1671_v45, %v1530_v7 }
 0x717   :  { %v1603_v61 = vadd.f32 %v1602_v3, %v1526_v32 }
 0x718   :  { %v1679_v10 = vadd.f32 %v1985_v40, %v1601_v52 }
 0x719   :  { %v1686_v41 = vadd.f32 %v1986_v22, %v1603_v61 }
 0x71a   :  { %v1988_v31 = vmul.f32 -1.442695, %v1679_v10 }
 0x71b   :  { %v1989_v51 = vmul.f32 -1.442695, %v1686_v41 }
 0x71c   :  { %2924 = vpow2.f32 %v1988_v31 }
 0x71d   :  { %2926 = vpow2.f32 %v1989_v51 }
 0x726   :  { %v2925_v59 = vpop.eup %2924 }
 0x727   :  { %v1683_v6 = vadd.f32 1.0, %v2925_v59  ;;  %v2927_v1 = vpop.eup %2926 }
 0x728   :  { %v1690_v14 = vadd.f32 1.0, %v2927_v1 }
 0x729   :  { %2928 = vrcp.f32 %v1683_v6 }
 0x72a   :  { %2930 = vrcp.f32 %v1690_v14 }
 0x733   :  { %v2929_v34 = vpop.eup %2928 }
 0x734   :  { %v1693_v47 = vmul.f32 %v2929_v34, %v1672_v27  ;;  %v2931_v8 = vpop.eup %2930 }
 0x735   :  { %v1696_v13 = vsub.f32 1.0, %v2931_v8  ;;  %v1698_v23 = vmul.f32 %v2931_v8, %v3752_v0 }
 0x736   :  { %v1694_v49 = vadd.f32 %v1987_v35, %v1693_v47 }
 0x738   :  { %2932 = vtanh.f32 %v1694_v49 }
 0x742   :  { %v2933_v11 = vpop.eup %2932 }
 0x743   :  { %v1697_v19 = vmul.f32 %v2933_v11, %v1696_v13 }
 0x745   :  { %v1699_v26 = vadd.f32 %v1698_v23, %v1697_v19 }
 0x747   :  { %1990 = vst [vmem:[%s3834_s4 + $0x30] sm:$0xff] %v1699_v26  ;;  %1840 = vmatmul.mubr.f32.vlgmr.msra.gmra.mrb[14].mxu0 %v1699_v26  ;;  %2411 = vmatmul.mubr.f32.vlgmr.msra.gmra.mrb[14].mxu1 %v1699_v26 }
 0x81a   :  { %v1841_v18 = vpop.f32.mrb[14].mxu0  ;;  %v1912_v43 = vpop.f32.mrb[14].mxu1 }
 0x81b   :  { %v1842_v44 = vadd.f32 %v1841_v18, %v1763_v30  ;;  %v1843_v53 = vpop.f32.mrb[15].mxu0  ;;  %v2412_v25 = vpop.f32.mrb[15].mxu1  ;;  %v1913_v33 = vadd.f32 %v1912_v43, %v1771_v21 }
 0x81c   :  { %v1844_v54 = vadd.f32 %v1843_v53, %v1767_v38 }
 0x81d   :  { %v1920_v56 = vadd.f32 %v1991_v39, %v1842_v44 }
 0x81e   :  { %v1927_v9 = vadd.f32 %v1992_v58, %v1844_v54 }
 0x81f   :  { %v1994_v62 = vmul.f32 -1.442695, %v1920_v56 }
 0x820   :  { %v1995_v20 = vmul.f32 -1.442695, %v1927_v9 }
 0x821   :  { %2934 = vpow2.f32 %v1994_v62 }
 0x822   :  { %2936 = vpow2.f32 %v1995_v20 }
 0x82b   :  { %v2935_v24 = vpop.eup %2934 }
 0x82c   :  { %v1924_v15 = vadd.f32 1.0, %v2935_v24  ;;  %v2937_v16 = vpop.eup %2936 }
 0x82d   :  { %v1931_v29 = vadd.f32 1.0, %v2937_v16 }
 0x82e   :  { %2938 = vrcp.f32 %v1924_v15 }
 0x82f   :  { %2940 = vrcp.f32 %v1931_v29 }
 0x838   :  { %v2939_v37 = vpop.eup %2938 }
 0x839   :  { %v1934_v46 = vmul.f32 %v2939_v37, %v1913_v33  ;;  %v2941_v55 = vpop.eup %2940 }
 0x83a   :  { %v1937_v60 = vsub.f32 1.0, %v2941_v55  ;;  %v1939_v12 = vmul.f32 %v2941_v55, %v1699_v26 }
 0x83b   :  { %v1935_v50 = vadd.f32 %v1993_v42, %v1934_v46 }
 0x83d   :  { %2942 = vtanh.f32 %v1935_v50 }
 0x847   :  { %v2943_v63 = vpop.eup %2942 }
 0x848   :  { %v1938_v2 = vmul.f32 %v2943_v63, %v1937_v60 }
 0x84a   :  { %v1940_v17 = vadd.f32 %v1939_v12, %v1938_v2 }
 0x84c   :  { %1996 = vst [vmem:[%s3834_s4 + $0x38] sm:$0xff] %v1940_v17 }

</bundles_post_ra>
